<compile_context>
chip_gen: v7x
topology: tpu7x:2x2x1
jax: 0.10.0
libtpu: 0.0.40
codegen_flags: <defaults>
</compile_context>

<pallas_src>
import jax
import jax.numpy as jnp
from jax.experimental import pallas as pl
from jax.experimental.pallas import tpu as pltpu

LANE = 128
SUBLANE = 8

# Network dims and flat-parameter layout (PyTorch nn.Linear storage: W is (out, in)).
N_IN, N_H1, N_H2 = 2, 16, 8
O_W1 = 0                       # w1 (16, 2) row-major
O_B1 = O_W1 + N_H1 * N_IN      # 32
O_W2 = O_B1 + N_H1             # 48, w2 (8, 16) row-major
O_B2 = O_W2 + N_H2 * N_H1      # 176
O_W3 = O_B2 + N_H2             # 184, w3 (1, 8)
O_B3 = O_W3 + N_H2             # 192
N_PARAMS = O_B3 + 1            # 193


def _round_up(n, m):
    return ((n + m - 1) // m) * m


def mlp_kernel(theta_ref, x_ref, o_ref):
    """theta_ref: SMEM (193,) f32.  x_ref: VMEM (2, ts, 128).  o_ref: VMEM (ts, 128)."""
    ts = o_ref.shape[0]

    # Hoist all scalar parameter reads out of the (unrolled) chunk loop:
    # one SMEM load each per grid step, reused by every chunk's FMAs.
    th = [theta_ref[i] for i in range(N_PARAMS)]

    # Process the batch tile in 8-sublane (one-vreg-per-value) chunks so the
    # streamed FMA accumulators stay comfortably inside the 64-vreg file.
    for c in range(ts // SUBLANE):
        lo, hi = c * SUBLANE, (c + 1) * SUBLANE
        x0 = x_ref[0, lo:hi, :]                       # (8, 128) batch slab, feature 0
        x1 = x_ref[1, lo:hi, :]                       # (8, 128) batch slab, feature 1

        # Layer 1 + layer 2 fused stream: each hidden-1 unit is produced and
        # immediately folded into the 8 layer-2 accumulators, then dies.
        acc2 = [None] * N_H2
        for h in range(N_H1):
            h1 = jnp.maximum(
                th[O_W1 + 2 * h] * x0
                + th[O_W1 + 2 * h + 1] * x1
                + th[O_B1 + h],
                0.0,
            )
            for j in range(N_H2):
                t = th[O_W2 + N_H1 * j + h] * h1
                acc2[j] = t if acc2[j] is None else acc2[j] + t

        # Layer 2 ReLU + layer 3.
        out = None
        for j in range(N_H2):
            h2 = jnp.maximum(acc2[j] + th[O_B2 + j], 0.0)
            t = th[O_W3 + j] * h2
            out = t if out is None else out + t

        o_ref[lo:hi, :] = out + th[O_B3]


def pack_params(params):
    """Flatten (w1,b1,w2,b2,w3,b3) into one f32 vector matching the kernel layout."""
    w1, b1, w2, b2, w3, b3 = params
    theta = jnp.concatenate(
        [w1.reshape(-1), b1.reshape(-1),
         w2.reshape(-1), b2.reshape(-1),
         w3.reshape(-1), b3.reshape(-1)]
    ).astype(jnp.float32)
    assert theta.shape == (N_PARAMS,)
    return theta


def physical_model_forward(x, params, *, max_tile_sublanes=128):
    """x: (B, 2) f32 -> (B, 1) f32, identical semantics to PhysicalModel.forward."""
    B = x.shape[0]
    assert x.shape[1] == N_IN
    theta = pack_params(params)

    # Tile sizing: each tile is (ts sublane-rows) x (128 lanes) batch elements.
    rows_needed = _round_up(max(B, 1), LANE) // LANE
    ts = min(max_tile_sublanes, _round_up(rows_needed, SUBLANE))
    tile_batch = ts * LANE
    Bp = _round_up(B, tile_batch)                 # pad batch to a whole number of tiles
    n_rows = Bp // LANE
    grid = (Bp // tile_batch,)

    # Layout plumbing (wrapper side): batch onto sublane+lane axes.
    x_pad = jnp.pad(x.astype(jnp.float32), ((0, Bp - B), (0, 0)))   # (Bp, 2)
    x_t = x_pad.T.reshape(N_IN, n_rows, LANE)                       # (2, rows, 128)

    y_t = pl.pallas_call(
        mlp_kernel,
        out_shape=jax.ShapeDtypeStruct((n_rows, LANE), jnp.float32),
        grid=grid,
        in_specs=[
            # 193 packed params, resident in SMEM for scalar splats.
            pl.BlockSpec(memory_space=pltpu.MemorySpace.SMEM),
            # x tile: (2, ts, 128), batch-tiled along the rows axis.
            pl.BlockSpec((N_IN, ts, LANE), lambda i: (0, i, 0)),
        ],
        out_specs=pl.BlockSpec((ts, LANE), lambda i: (i, 0)),
        compiler_params=pltpu.CompilerParams(
            dimension_semantics=("parallel",),    # v7x: shard batch tiles across both TCs
        ),
    )(theta, x_t)

    # Back to (B, 1).
    return y_t.reshape(Bp)[:B].reshape(B, 1)


def init_params(key):
    """Deterministic init matching PyTorch nn.Linear default U(-1/sqrt(fan_in), +)."""
    sizes = [(N_H1, N_IN), (N_H2, N_H1), (1, N_H2)]   # (out_features, in_features)
    params = []
    for i, (fan_out, fan_in) in enumerate(sizes):
        kw, kb = jax.random.split(jax.random.fold_in(key, i))
        bound = 1.0 / (fan_in ** 0.5)
        w = jax.random.uniform(kw, (fan_out, fan_in), jnp.float32, -bound, bound)
        b = jax.random.uniform(kb, (fan_out,), jnp.float32, -bound, bound)
        params.extend([w, b])
    return tuple(params)


def reference_forward(x, params):
    w1, b1, w2, b2, w3, b3 = params
    h1 = jnp.maximum(x @ w1.T + b1, 0.0)
    h2 = jnp.maximum(h1 @ w2.T + b2, 0.0)
    return h2 @ w3.T + b3


if __name__ == "__main__":
    key = jax.random.PRNGKey(0)
    params = init_params(key)

    # Small example consistent with the module: batch=8, features=2.
    batch = 8
    x = jax.random.normal(jax.random.fold_in(key, 100), (batch, N_IN), jnp.float32)

    out = jax.block_until_ready(physical_model_forward(x, params))
    ref = reference_forward(x, params)
    assert out.shape == (batch, 1)
    assert jnp.allclose(out, ref, atol=1e-5, rtol=1e-5)

    # Extra check: multi-tile grid + batch-padding/remainder path.
    batch2 = 2500
    x2 = jax.random.normal(jax.random.fold_in(key, 200), (batch2, N_IN), jnp.float32)
    out2 = jax.block_until_ready(
        physical_model_forward(x2, params, max_tile_sublanes=8)
    )
    ref2 = reference_forward(x2, params)
    assert out2.shape == (batch2, 1)
    assert jnp.allclose(out2, ref2, atol=1e-5, rtol=1e-5)

    print("KERNEL_OK")
</pallas_src>

<mosaic_0001>
module attributes {stable_mosaic.version = 11 : i64} {
  func.func @mlp_kernel(%arg0: i32, %arg1: memref<193xf32, #tpu.memory_space<smem>>, %arg2: memref<2x8x128xf32, #tpu.memory_space<vmem>>, %arg3: memref<8x128xf32, #tpu.memory_space<vmem>>) attributes {dimension_semantics = [#tpu.dimension_semantics<parallel>], iteration_bounds = array<i64: 1>, scalar_prefetch = 0 : i64, scratch_operands = 0 : i64, tpu.core_type = #tpu.core_type<tc>, window_params = [{transform_indices = @transform_0, window_bounds = array<i64: 193>}, {transform_indices = @transform_1, window_bounds = array<i64: 2, 8, 128>}, {transform_indices = @transform_2, window_bounds = array<i64: 8, 128>}]} {
    %c0 = arith.constant 0 : index
    %0 = memref.load %arg1[%c0] : memref<193xf32, #tpu.memory_space<smem>>
    %c1 = arith.constant 1 : index
    %1 = memref.load %arg1[%c1] : memref<193xf32, #tpu.memory_space<smem>>
    %c2 = arith.constant 2 : index
    %2 = memref.load %arg1[%c2] : memref<193xf32, #tpu.memory_space<smem>>
    %c3 = arith.constant 3 : index
    %3 = memref.load %arg1[%c3] : memref<193xf32, #tpu.memory_space<smem>>
    %c4 = arith.constant 4 : index
    %4 = memref.load %arg1[%c4] : memref<193xf32, #tpu.memory_space<smem>>
    %c5 = arith.constant 5 : index
    %5 = memref.load %arg1[%c5] : memref<193xf32, #tpu.memory_space<smem>>
    %c6 = arith.constant 6 : index
    %6 = memref.load %arg1[%c6] : memref<193xf32, #tpu.memory_space<smem>>
    %c7 = arith.constant 7 : index
    %7 = memref.load %arg1[%c7] : memref<193xf32, #tpu.memory_space<smem>>
    %c8 = arith.constant 8 : index
    %8 = memref.load %arg1[%c8] : memref<193xf32, #tpu.memory_space<smem>>
    %c9 = arith.constant 9 : index
    %9 = memref.load %arg1[%c9] : memref<193xf32, #tpu.memory_space<smem>>
    %c10 = arith.constant 10 : index
    %10 = memref.load %arg1[%c10] : memref<193xf32, #tpu.memory_space<smem>>
    %c11 = arith.constant 11 : index
    %11 = memref.load %arg1[%c11] : memref<193xf32, #tpu.memory_space<smem>>
    %c12 = arith.constant 12 : index
    %12 = memref.load %arg1[%c12] : memref<193xf32, #tpu.memory_space<smem>>
    %c13 = arith.constant 13 : index
    %13 = memref.load %arg1[%c13] : memref<193xf32, #tpu.memory_space<smem>>
    %c14 = arith.constant 14 : index
    %14 = memref.load %arg1[%c14] : memref<193xf32, #tpu.memory_space<smem>>
    %c15 = arith.constant 15 : index
    %15 = memref.load %arg1[%c15] : memref<193xf32, #tpu.memory_space<smem>>
    %c16 = arith.constant 16 : index
    %16 = memref.load %arg1[%c16] : memref<193xf32, #tpu.memory_space<smem>>
    %c17 = arith.constant 17 : index
    %17 = memref.load %arg1[%c17] : memref<193xf32, #tpu.memory_space<smem>>
    %c18 = arith.constant 18 : index
    %18 = memref.load %arg1[%c18] : memref<193xf32, #tpu.memory_space<smem>>
    %c19 = arith.constant 19 : index
    %19 = memref.load %arg1[%c19] : memref<193xf32, #tpu.memory_space<smem>>
    %c20 = arith.constant 20 : index
    %20 = memref.load %arg1[%c20] : memref<193xf32, #tpu.memory_space<smem>>
    %c21 = arith.constant 21 : index
    %21 = memref.load %arg1[%c21] : memref<193xf32, #tpu.memory_space<smem>>
    %c22 = arith.constant 22 : index
    %22 = memref.load %arg1[%c22] : memref<193xf32, #tpu.memory_space<smem>>
    %c23 = arith.constant 23 : index
    %23 = memref.load %arg1[%c23] : memref<193xf32, #tpu.memory_space<smem>>
    %c24 = arith.constant 24 : index
    %24 = memref.load %arg1[%c24] : memref<193xf32, #tpu.memory_space<smem>>
    %c25 = arith.constant 25 : index
    %25 = memref.load %arg1[%c25] : memref<193xf32, #tpu.memory_space<smem>>
    %c26 = arith.constant 26 : index
    %26 = memref.load %arg1[%c26] : memref<193xf32, #tpu.memory_space<smem>>
    %c27 = arith.constant 27 : index
    %27 = memref.load %arg1[%c27] : memref<193xf32, #tpu.memory_space<smem>>
    %c28 = arith.constant 28 : index
    %28 = memref.load %arg1[%c28] : memref<193xf32, #tpu.memory_space<smem>>
    %c29 = arith.constant 29 : index
    %29 = memref.load %arg1[%c29] : memref<193xf32, #tpu.memory_space<smem>>
    %c30 = arith.constant 30 : index
    %30 = memref.load %arg1[%c30] : memref<193xf32, #tpu.memory_space<smem>>
    %c31 = arith.constant 31 : index
    %31 = memref.load %arg1[%c31] : memref<193xf32, #tpu.memory_space<smem>>
    %c32 = arith.constant 32 : index
    %32 = memref.load %arg1[%c32] : memref<193xf32, #tpu.memory_space<smem>>
    %c33 = arith.constant 33 : index
    %33 = memref.load %arg1[%c33] : memref<193xf32, #tpu.memory_space<smem>>
    %c34 = arith.constant 34 : index
    %34 = memref.load %arg1[%c34] : memref<193xf32, #tpu.memory_space<smem>>
    %c35 = arith.constant 35 : index
    %35 = memref.load %arg1[%c35] : memref<193xf32, #tpu.memory_space<smem>>
    %c36 = arith.constant 36 : index
    %36 = memref.load %arg1[%c36] : memref<193xf32, #tpu.memory_space<smem>>
    %c37 = arith.constant 37 : index
    %37 = memref.load %arg1[%c37] : memref<193xf32, #tpu.memory_space<smem>>
    %c38 = arith.constant 38 : index
    %38 = memref.load %arg1[%c38] : memref<193xf32, #tpu.memory_space<smem>>
    %c39 = arith.constant 39 : index
    %39 = memref.load %arg1[%c39] : memref<193xf32, #tpu.memory_space<smem>>
    %c40 = arith.constant 40 : index
    %40 = memref.load %arg1[%c40] : memref<193xf32, #tpu.memory_space<smem>>
    %c41 = arith.constant 41 : index
    %41 = memref.load %arg1[%c41] : memref<193xf32, #tpu.memory_space<smem>>
    %c42 = arith.constant 42 : index
    %42 = memref.load %arg1[%c42] : memref<193xf32, #tpu.memory_space<smem>>
    %c43 = arith.constant 43 : index
    %43 = memref.load %arg1[%c43] : memref<193xf32, #tpu.memory_space<smem>>
    %c44 = arith.constant 44 : index
    %44 = memref.load %arg1[%c44] : memref<193xf32, #tpu.memory_space<smem>>
    %c45 = arith.constant 45 : index
    %45 = memref.load %arg1[%c45] : memref<193xf32, #tpu.memory_space<smem>>
    %c46 = arith.constant 46 : index
    %46 = memref.load %arg1[%c46] : memref<193xf32, #tpu.memory_space<smem>>
    %c47 = arith.constant 47 : index
    %47 = memref.load %arg1[%c47] : memref<193xf32, #tpu.memory_space<smem>>
    %c48 = arith.constant 48 : index
    %48 = memref.load %arg1[%c48] : memref<193xf32, #tpu.memory_space<smem>>
    %c49 = arith.constant 49 : index
    %49 = memref.load %arg1[%c49] : memref<193xf32, #tpu.memory_space<smem>>
    %c50 = arith.constant 50 : index
    %50 = memref.load %arg1[%c50] : memref<193xf32, #tpu.memory_space<smem>>
    %c51 = arith.constant 51 : index
    %51 = memref.load %arg1[%c51] : memref<193xf32, #tpu.memory_space<smem>>
    %c52 = arith.constant 52 : index
    %52 = memref.load %arg1[%c52] : memref<193xf32, #tpu.memory_space<smem>>
    %c53 = arith.constant 53 : index
    %53 = memref.load %arg1[%c53] : memref<193xf32, #tpu.memory_space<smem>>
    %c54 = arith.constant 54 : index
    %54 = memref.load %arg1[%c54] : memref<193xf32, #tpu.memory_space<smem>>
    %c55 = arith.constant 55 : index
    %55 = memref.load %arg1[%c55] : memref<193xf32, #tpu.memory_space<smem>>
    %c56 = arith.constant 56 : index
    %56 = memref.load %arg1[%c56] : memref<193xf32, #tpu.memory_space<smem>>
    %c57 = arith.constant 57 : index
    %57 = memref.load %arg1[%c57] : memref<193xf32, #tpu.memory_space<smem>>
    %c58 = arith.constant 58 : index
    %58 = memref.load %arg1[%c58] : memref<193xf32, #tpu.memory_space<smem>>
    %c59 = arith.constant 59 : index
    %59 = memref.load %arg1[%c59] : memref<193xf32, #tpu.memory_space<smem>>
    %c60 = arith.constant 60 : index
    %60 = memref.load %arg1[%c60] : memref<193xf32, #tpu.memory_space<smem>>
    %c61 = arith.constant 61 : index
    %61 = memref.load %arg1[%c61] : memref<193xf32, #tpu.memory_space<smem>>
    %c62 = arith.constant 62 : index
    %62 = memref.load %arg1[%c62] : memref<193xf32, #tpu.memory_space<smem>>
    %c63 = arith.constant 63 : index
    %63 = memref.load %arg1[%c63] : memref<193xf32, #tpu.memory_space<smem>>
    %c64 = arith.constant 64 : index
    %64 = memref.load %arg1[%c64] : memref<193xf32, #tpu.memory_space<smem>>
    %c65 = arith.constant 65 : index
    %65 = memref.load %arg1[%c65] : memref<193xf32, #tpu.memory_space<smem>>
    %c66 = arith.constant 66 : index
    %66 = memref.load %arg1[%c66] : memref<193xf32, #tpu.memory_space<smem>>
    %c67 = arith.constant 67 : index
    %67 = memref.load %arg1[%c67] : memref<193xf32, #tpu.memory_space<smem>>
    %c68 = arith.constant 68 : index
    %68 = memref.load %arg1[%c68] : memref<193xf32, #tpu.memory_space<smem>>
    %c69 = arith.constant 69 : index
    %69 = memref.load %arg1[%c69] : memref<193xf32, #tpu.memory_space<smem>>
    %c70 = arith.constant 70 : index
    %70 = memref.load %arg1[%c70] : memref<193xf32, #tpu.memory_space<smem>>
    %c71 = arith.constant 71 : index
    %71 = memref.load %arg1[%c71] : memref<193xf32, #tpu.memory_space<smem>>
    %c72 = arith.constant 72 : index
    %72 = memref.load %arg1[%c72] : memref<193xf32, #tpu.memory_space<smem>>
    %c73 = arith.constant 73 : index
    %73 = memref.load %arg1[%c73] : memref<193xf32, #tpu.memory_space<smem>>
    %c74 = arith.constant 74 : index
    %74 = memref.load %arg1[%c74] : memref<193xf32, #tpu.memory_space<smem>>
    %c75 = arith.constant 75 : index
    %75 = memref.load %arg1[%c75] : memref<193xf32, #tpu.memory_space<smem>>
    %c76 = arith.constant 76 : index
    %76 = memref.load %arg1[%c76] : memref<193xf32, #tpu.memory_space<smem>>
    %c77 = arith.constant 77 : index
    %77 = memref.load %arg1[%c77] : memref<193xf32, #tpu.memory_space<smem>>
    %c78 = arith.constant 78 : index
    %78 = memref.load %arg1[%c78] : memref<193xf32, #tpu.memory_space<smem>>
    %c79 = arith.constant 79 : index
    %79 = memref.load %arg1[%c79] : memref<193xf32, #tpu.memory_space<smem>>
    %c80 = arith.constant 80 : index
    %80 = memref.load %arg1[%c80] : memref<193xf32, #tpu.memory_space<smem>>
    %c81 = arith.constant 81 : index
    %81 = memref.load %arg1[%c81] : memref<193xf32, #tpu.memory_space<smem>>
    %c82 = arith.constant 82 : index
    %82 = memref.load %arg1[%c82] : memref<193xf32, #tpu.memory_space<smem>>
    %c83 = arith.constant 83 : index
    %83 = memref.load %arg1[%c83] : memref<193xf32, #tpu.memory_space<smem>>
    %c84 = arith.constant 84 : index
    %84 = memref.load %arg1[%c84] : memref<193xf32, #tpu.memory_space<smem>>
    %c85 = arith.constant 85 : index
    %85 = memref.load %arg1[%c85] : memref<193xf32, #tpu.memory_space<smem>>
    %c86 = arith.constant 86 : index
    %86 = memref.load %arg1[%c86] : memref<193xf32, #tpu.memory_space<smem>>
    %c87 = arith.constant 87 : index
    %87 = memref.load %arg1[%c87] : memref<193xf32, #tpu.memory_space<smem>>
    %c88 = arith.constant 88 : index
    %88 = memref.load %arg1[%c88] : memref<193xf32, #tpu.memory_space<smem>>
    %c89 = arith.constant 89 : index
    %89 = memref.load %arg1[%c89] : memref<193xf32, #tpu.memory_space<smem>>
    %c90 = arith.constant 90 : index
    %90 = memref.load %arg1[%c90] : memref<193xf32, #tpu.memory_space<smem>>
    %c91 = arith.constant 91 : index
    %91 = memref.load %arg1[%c91] : memref<193xf32, #tpu.memory_space<smem>>
    %c92 = arith.constant 92 : index
    %92 = memref.load %arg1[%c92] : memref<193xf32, #tpu.memory_space<smem>>
    %c93 = arith.constant 93 : index
    %93 = memref.load %arg1[%c93] : memref<193xf32, #tpu.memory_space<smem>>
    %c94 = arith.constant 94 : index
    %94 = memref.load %arg1[%c94] : memref<193xf32, #tpu.memory_space<smem>>
    %c95 = arith.constant 95 : index
    %95 = memref.load %arg1[%c95] : memref<193xf32, #tpu.memory_space<smem>>
    %c96 = arith.constant 96 : index
    %96 = memref.load %arg1[%c96] : memref<193xf32, #tpu.memory_space<smem>>
    %c97 = arith.constant 97 : index
    %97 = memref.load %arg1[%c97] : memref<193xf32, #tpu.memory_space<smem>>
    %c98 = arith.constant 98 : index
    %98 = memref.load %arg1[%c98] : memref<193xf32, #tpu.memory_space<smem>>
    %c99 = arith.constant 99 : index
    %99 = memref.load %arg1[%c99] : memref<193xf32, #tpu.memory_space<smem>>
    %c100 = arith.constant 100 : index
    %100 = memref.load %arg1[%c100] : memref<193xf32, #tpu.memory_space<smem>>
    %c101 = arith.constant 101 : index
    %101 = memref.load %arg1[%c101] : memref<193xf32, #tpu.memory_space<smem>>
    %c102 = arith.constant 102 : index
    %102 = memref.load %arg1[%c102] : memref<193xf32, #tpu.memory_space<smem>>
    %c103 = arith.constant 103 : index
    %103 = memref.load %arg1[%c103] : memref<193xf32, #tpu.memory_space<smem>>
    %c104 = arith.constant 104 : index
    %104 = memref.load %arg1[%c104] : memref<193xf32, #tpu.memory_space<smem>>
    %c105 = arith.constant 105 : index
    %105 = memref.load %arg1[%c105] : memref<193xf32, #tpu.memory_space<smem>>
    %c106 = arith.constant 106 : index
    %106 = memref.load %arg1[%c106] : memref<193xf32, #tpu.memory_space<smem>>
    %c107 = arith.constant 107 : index
    %107 = memref.load %arg1[%c107] : memref<193xf32, #tpu.memory_space<smem>>
    %c108 = arith.constant 108 : index
    %108 = memref.load %arg1[%c108] : memref<193xf32, #tpu.memory_space<smem>>
    %c109 = arith.constant 109 : index
    %109 = memref.load %arg1[%c109] : memref<193xf32, #tpu.memory_space<smem>>
    %c110 = arith.constant 110 : index
    %110 = memref.load %arg1[%c110] : memref<193xf32, #tpu.memory_space<smem>>
    %c111 = arith.constant 111 : index
    %111 = memref.load %arg1[%c111] : memref<193xf32, #tpu.memory_space<smem>>
    %c112 = arith.constant 112 : index
    %112 = memref.load %arg1[%c112] : memref<193xf32, #tpu.memory_space<smem>>
    %c113 = arith.constant 113 : index
    %113 = memref.load %arg1[%c113] : memref<193xf32, #tpu.memory_space<smem>>
    %c114 = arith.constant 114 : index
    %114 = memref.load %arg1[%c114] : memref<193xf32, #tpu.memory_space<smem>>
    %c115 = arith.constant 115 : index
    %115 = memref.load %arg1[%c115] : memref<193xf32, #tpu.memory_space<smem>>
    %c116 = arith.constant 116 : index
    %116 = memref.load %arg1[%c116] : memref<193xf32, #tpu.memory_space<smem>>
    %c117 = arith.constant 117 : index
    %117 = memref.load %arg1[%c117] : memref<193xf32, #tpu.memory_space<smem>>
    %c118 = arith.constant 118 : index
    %118 = memref.load %arg1[%c118] : memref<193xf32, #tpu.memory_space<smem>>
    %c119 = arith.constant 119 : index
    %119 = memref.load %arg1[%c119] : memref<193xf32, #tpu.memory_space<smem>>
    %c120 = arith.constant 120 : index
    %120 = memref.load %arg1[%c120] : memref<193xf32, #tpu.memory_space<smem>>
    %c121 = arith.constant 121 : index
    %121 = memref.load %arg1[%c121] : memref<193xf32, #tpu.memory_space<smem>>
    %c122 = arith.constant 122 : index
    %122 = memref.load %arg1[%c122] : memref<193xf32, #tpu.memory_space<smem>>
    %c123 = arith.constant 123 : index
    %123 = memref.load %arg1[%c123] : memref<193xf32, #tpu.memory_space<smem>>
    %c124 = arith.constant 124 : index
    %124 = memref.load %arg1[%c124] : memref<193xf32, #tpu.memory_space<smem>>
    %c125 = arith.constant 125 : index
    %125 = memref.load %arg1[%c125] : memref<193xf32, #tpu.memory_space<smem>>
    %c126 = arith.constant 126 : index
    %126 = memref.load %arg1[%c126] : memref<193xf32, #tpu.memory_space<smem>>
    %c127 = arith.constant 127 : index
    %127 = memref.load %arg1[%c127] : memref<193xf32, #tpu.memory_space<smem>>
    %c128 = arith.constant 128 : index
    %128 = memref.load %arg1[%c128] : memref<193xf32, #tpu.memory_space<smem>>
    %c129 = arith.constant 129 : index
    %129 = memref.load %arg1[%c129] : memref<193xf32, #tpu.memory_space<smem>>
    %c130 = arith.constant 130 : index
    %130 = memref.load %arg1[%c130] : memref<193xf32, #tpu.memory_space<smem>>
    %c131 = arith.constant 131 : index
    %131 = memref.load %arg1[%c131] : memref<193xf32, #tpu.memory_space<smem>>
    %c132 = arith.constant 132 : index
    %132 = memref.load %arg1[%c132] : memref<193xf32, #tpu.memory_space<smem>>
    %c133 = arith.constant 133 : index
    %133 = memref.load %arg1[%c133] : memref<193xf32, #tpu.memory_space<smem>>
    %c134 = arith.constant 134 : index
    %134 = memref.load %arg1[%c134] : memref<193xf32, #tpu.memory_space<smem>>
    %c135 = arith.constant 135 : index
    %135 = memref.load %arg1[%c135] : memref<193xf32, #tpu.memory_space<smem>>
    %c136 = arith.constant 136 : index
    %136 = memref.load %arg1[%c136] : memref<193xf32, #tpu.memory_space<smem>>
    %c137 = arith.constant 137 : index
    %137 = memref.load %arg1[%c137] : memref<193xf32, #tpu.memory_space<smem>>
    %c138 = arith.constant 138 : index
    %138 = memref.load %arg1[%c138] : memref<193xf32, #tpu.memory_space<smem>>
    %c139 = arith.constant 139 : index
    %139 = memref.load %arg1[%c139] : memref<193xf32, #tpu.memory_space<smem>>
    %c140 = arith.constant 140 : index
    %140 = memref.load %arg1[%c140] : memref<193xf32, #tpu.memory_space<smem>>
    %c141 = arith.constant 141 : index
    %141 = memref.load %arg1[%c141] : memref<193xf32, #tpu.memory_space<smem>>
    %c142 = arith.constant 142 : index
    %142 = memref.load %arg1[%c142] : memref<193xf32, #tpu.memory_space<smem>>
    %c143 = arith.constant 143 : index
    %143 = memref.load %arg1[%c143] : memref<193xf32, #tpu.memory_space<smem>>
    %c144 = arith.constant 144 : index
    %144 = memref.load %arg1[%c144] : memref<193xf32, #tpu.memory_space<smem>>
    %c145 = arith.constant 145 : index
    %145 = memref.load %arg1[%c145] : memref<193xf32, #tpu.memory_space<smem>>
    %c146 = arith.constant 146 : index
    %146 = memref.load %arg1[%c146] : memref<193xf32, #tpu.memory_space<smem>>
    %c147 = arith.constant 147 : index
    %147 = memref.load %arg1[%c147] : memref<193xf32, #tpu.memory_space<smem>>
    %c148 = arith.constant 148 : index
    %148 = memref.load %arg1[%c148] : memref<193xf32, #tpu.memory_space<smem>>
    %c149 = arith.constant 149 : index
    %149 = memref.load %arg1[%c149] : memref<193xf32, #tpu.memory_space<smem>>
    %c150 = arith.constant 150 : index
    %150 = memref.load %arg1[%c150] : memref<193xf32, #tpu.memory_space<smem>>
    %c151 = arith.constant 151 : index
    %151 = memref.load %arg1[%c151] : memref<193xf32, #tpu.memory_space<smem>>
    %c152 = arith.constant 152 : index
    %152 = memref.load %arg1[%c152] : memref<193xf32, #tpu.memory_space<smem>>
    %c153 = arith.constant 153 : index
    %153 = memref.load %arg1[%c153] : memref<193xf32, #tpu.memory_space<smem>>
    %c154 = arith.constant 154 : index
    %154 = memref.load %arg1[%c154] : memref<193xf32, #tpu.memory_space<smem>>
    %c155 = arith.constant 155 : index
    %155 = memref.load %arg1[%c155] : memref<193xf32, #tpu.memory_space<smem>>
    %c156 = arith.constant 156 : index
    %156 = memref.load %arg1[%c156] : memref<193xf32, #tpu.memory_space<smem>>
    %c157 = arith.constant 157 : index
    %157 = memref.load %arg1[%c157] : memref<193xf32, #tpu.memory_space<smem>>
    %c158 = arith.constant 158 : index
    %158 = memref.load %arg1[%c158] : memref<193xf32, #tpu.memory_space<smem>>
    %c159 = arith.constant 159 : index
    %159 = memref.load %arg1[%c159] : memref<193xf32, #tpu.memory_space<smem>>
    %c160 = arith.constant 160 : index
    %160 = memref.load %arg1[%c160] : memref<193xf32, #tpu.memory_space<smem>>
    %c161 = arith.constant 161 : index
    %161 = memref.load %arg1[%c161] : memref<193xf32, #tpu.memory_space<smem>>
    %c162 = arith.constant 162 : index
    %162 = memref.load %arg1[%c162] : memref<193xf32, #tpu.memory_space<smem>>
    %c163 = arith.constant 163 : index
    %163 = memref.load %arg1[%c163] : memref<193xf32, #tpu.memory_space<smem>>
    %c164 = arith.constant 164 : index
    %164 = memref.load %arg1[%c164] : memref<193xf32, #tpu.memory_space<smem>>
    %c165 = arith.constant 165 : index
    %165 = memref.load %arg1[%c165] : memref<193xf32, #tpu.memory_space<smem>>
    %c166 = arith.constant 166 : index
    %166 = memref.load %arg1[%c166] : memref<193xf32, #tpu.memory_space<smem>>
    %c167 = arith.constant 167 : index
    %167 = memref.load %arg1[%c167] : memref<193xf32, #tpu.memory_space<smem>>
    %c168 = arith.constant 168 : index
    %168 = memref.load %arg1[%c168] : memref<193xf32, #tpu.memory_space<smem>>
    %c169 = arith.constant 169 : index
    %169 = memref.load %arg1[%c169] : memref<193xf32, #tpu.memory_space<smem>>
    %c170 = arith.constant 170 : index
    %170 = memref.load %arg1[%c170] : memref<193xf32, #tpu.memory_space<smem>>
    %c171 = arith.constant 171 : index
    %171 = memref.load %arg1[%c171] : memref<193xf32, #tpu.memory_space<smem>>
    %c172 = arith.constant 172 : index
    %172 = memref.load %arg1[%c172] : memref<193xf32, #tpu.memory_space<smem>>
    %c173 = arith.constant 173 : index
    %173 = memref.load %arg1[%c173] : memref<193xf32, #tpu.memory_space<smem>>
    %c174 = arith.constant 174 : index
    %174 = memref.load %arg1[%c174] : memref<193xf32, #tpu.memory_space<smem>>
    %c175 = arith.constant 175 : index
    %175 = memref.load %arg1[%c175] : memref<193xf32, #tpu.memory_space<smem>>
    %c176 = arith.constant 176 : index
    %176 = memref.load %arg1[%c176] : memref<193xf32, #tpu.memory_space<smem>>
    %c177 = arith.constant 177 : index
    %177 = memref.load %arg1[%c177] : memref<193xf32, #tpu.memory_space<smem>>
    %c178 = arith.constant 178 : index
    %178 = memref.load %arg1[%c178] : memref<193xf32, #tpu.memory_space<smem>>
    %c179 = arith.constant 179 : index
    %179 = memref.load %arg1[%c179] : memref<193xf32, #tpu.memory_space<smem>>
    %c180 = arith.constant 180 : index
    %180 = memref.load %arg1[%c180] : memref<193xf32, #tpu.memory_space<smem>>
    %c181 = arith.constant 181 : index
    %181 = memref.load %arg1[%c181] : memref<193xf32, #tpu.memory_space<smem>>
    %c182 = arith.constant 182 : index
    %182 = memref.load %arg1[%c182] : memref<193xf32, #tpu.memory_space<smem>>
    %c183 = arith.constant 183 : index
    %183 = memref.load %arg1[%c183] : memref<193xf32, #tpu.memory_space<smem>>
    %c184 = arith.constant 184 : index
    %184 = memref.load %arg1[%c184] : memref<193xf32, #tpu.memory_space<smem>>
    %c185 = arith.constant 185 : index
    %185 = memref.load %arg1[%c185] : memref<193xf32, #tpu.memory_space<smem>>
    %c186 = arith.constant 186 : index
    %186 = memref.load %arg1[%c186] : memref<193xf32, #tpu.memory_space<smem>>
    %c187 = arith.constant 187 : index
    %187 = memref.load %arg1[%c187] : memref<193xf32, #tpu.memory_space<smem>>
    %c188 = arith.constant 188 : index
    %188 = memref.load %arg1[%c188] : memref<193xf32, #tpu.memory_space<smem>>
    %c189 = arith.constant 189 : index
    %189 = memref.load %arg1[%c189] : memref<193xf32, #tpu.memory_space<smem>>
    %c190 = arith.constant 190 : index
    %190 = memref.load %arg1[%c190] : memref<193xf32, #tpu.memory_space<smem>>
    %c191 = arith.constant 191 : index
    %191 = memref.load %arg1[%c191] : memref<193xf32, #tpu.memory_space<smem>>
    %c192 = arith.constant 192 : index
    %192 = memref.load %arg1[%c192] : memref<193xf32, #tpu.memory_space<smem>>
    %c0_0 = arith.constant 0 : index
    %c0_1 = arith.constant 0 : index
    %c0_2 = arith.constant 0 : index
    %193 = vector.load %arg2[%c0_0, %c0_1, %c0_2] : memref<2x8x128xf32, #tpu.memory_space<vmem>>, vector<1x8x128xf32>
    %194 = vector.shape_cast %193 : vector<1x8x128xf32> to vector<8x128xf32>
    %c1_3 = arith.constant 1 : index
    %c0_4 = arith.constant 0 : index
    %c0_5 = arith.constant 0 : index
    %195 = vector.load %arg2[%c1_3, %c0_4, %c0_5] : memref<2x8x128xf32, #tpu.memory_space<vmem>>, vector<1x8x128xf32>
    %196 = vector.shape_cast %195 : vector<1x8x128xf32> to vector<8x128xf32>
    %197 = vector.broadcast %0 : f32 to vector<8x128xf32>
    %198 = arith.mulf %197, %194 : vector<8x128xf32>
    %199 = vector.broadcast %1 : f32 to vector<8x128xf32>
    %200 = arith.mulf %199, %196 : vector<8x128xf32>
    %201 = arith.addf %198, %200 : vector<8x128xf32>
    %202 = vector.broadcast %32 : f32 to vector<8x128xf32>
    %203 = arith.addf %201, %202 : vector<8x128xf32>
    %cst = arith.constant 0.000000e+00 : f32
    %204 = vector.broadcast %cst : f32 to vector<8x128xf32>
    %205 = arith.maximumf %203, %204 : vector<8x128xf32>
    %206 = vector.broadcast %48 : f32 to vector<8x128xf32>
    %207 = arith.mulf %206, %205 : vector<8x128xf32>
    %208 = vector.broadcast %64 : f32 to vector<8x128xf32>
    %209 = arith.mulf %208, %205 : vector<8x128xf32>
    %210 = vector.broadcast %80 : f32 to vector<8x128xf32>
    %211 = arith.mulf %210, %205 : vector<8x128xf32>
    %212 = vector.broadcast %96 : f32 to vector<8x128xf32>
    %213 = arith.mulf %212, %205 : vector<8x128xf32>
    %214 = vector.broadcast %112 : f32 to vector<8x128xf32>
    %215 = arith.mulf %214, %205 : vector<8x128xf32>
    %216 = vector.broadcast %128 : f32 to vector<8x128xf32>
    %217 = arith.mulf %216, %205 : vector<8x128xf32>
    %218 = vector.broadcast %144 : f32 to vector<8x128xf32>
    %219 = arith.mulf %218, %205 : vector<8x128xf32>
    %220 = vector.broadcast %160 : f32 to vector<8x128xf32>
    %221 = arith.mulf %220, %205 : vector<8x128xf32>
    %222 = vector.broadcast %2 : f32 to vector<8x128xf32>
    %223 = arith.mulf %222, %194 : vector<8x128xf32>
    %224 = vector.broadcast %3 : f32 to vector<8x128xf32>
    %225 = arith.mulf %224, %196 : vector<8x128xf32>
    %226 = arith.addf %223, %225 : vector<8x128xf32>
    %227 = vector.broadcast %33 : f32 to vector<8x128xf32>
    %228 = arith.addf %226, %227 : vector<8x128xf32>
    %cst_6 = arith.constant 0.000000e+00 : f32
    %229 = vector.broadcast %cst_6 : f32 to vector<8x128xf32>
    %230 = arith.maximumf %228, %229 : vector<8x128xf32>
    %231 = vector.broadcast %49 : f32 to vector<8x128xf32>
    %232 = arith.mulf %231, %230 : vector<8x128xf32>
    %233 = arith.addf %207, %232 : vector<8x128xf32>
    %234 = vector.broadcast %65 : f32 to vector<8x128xf32>
    %235 = arith.mulf %234, %230 : vector<8x128xf32>
    %236 = arith.addf %209, %235 : vector<8x128xf32>
    %237 = vector.broadcast %81 : f32 to vector<8x128xf32>
    %238 = arith.mulf %237, %230 : vector<8x128xf32>
    %239 = arith.addf %211, %238 : vector<8x128xf32>
    %240 = vector.broadcast %97 : f32 to vector<8x128xf32>
    %241 = arith.mulf %240, %230 : vector<8x128xf32>
    %242 = arith.addf %213, %241 : vector<8x128xf32>
    %243 = vector.broadcast %113 : f32 to vector<8x128xf32>
    %244 = arith.mulf %243, %230 : vector<8x128xf32>
    %245 = arith.addf %215, %244 : vector<8x128xf32>
    %246 = vector.broadcast %129 : f32 to vector<8x128xf32>
    %247 = arith.mulf %246, %230 : vector<8x128xf32>
    %248 = arith.addf %217, %247 : vector<8x128xf32>
    %249 = vector.broadcast %145 : f32 to vector<8x128xf32>
    %250 = arith.mulf %249, %230 : vector<8x128xf32>
    %251 = arith.addf %219, %250 : vector<8x128xf32>
    %252 = vector.broadcast %161 : f32 to vector<8x128xf32>
    %253 = arith.mulf %252, %230 : vector<8x128xf32>
    %254 = arith.addf %221, %253 : vector<8x128xf32>
    %255 = vector.broadcast %4 : f32 to vector<8x128xf32>
    %256 = arith.mulf %255, %194 : vector<8x128xf32>
    %257 = vector.broadcast %5 : f32 to vector<8x128xf32>
    %258 = arith.mulf %257, %196 : vector<8x128xf32>
    %259 = arith.addf %256, %258 : vector<8x128xf32>
    %260 = vector.broadcast %34 : f32 to vector<8x128xf32>
    %261 = arith.addf %259, %260 : vector<8x128xf32>
    %cst_7 = arith.constant 0.000000e+00 : f32
    %262 = vector.broadcast %cst_7 : f32 to vector<8x128xf32>
    %263 = arith.maximumf %261, %262 : vector<8x128xf32>
    %264 = vector.broadcast %50 : f32 to vector<8x128xf32>
    %265 = arith.mulf %264, %263 : vector<8x128xf32>
    %266 = arith.addf %233, %265 : vector<8x128xf32>
    %267 = vector.broadcast %66 : f32 to vector<8x128xf32>
    %268 = arith.mulf %267, %263 : vector<8x128xf32>
    %269 = arith.addf %236, %268 : vector<8x128xf32>
    %270 = vector.broadcast %82 : f32 to vector<8x128xf32>
    %271 = arith.mulf %270, %263 : vector<8x128xf32>
    %272 = arith.addf %239, %271 : vector<8x128xf32>
    %273 = vector.broadcast %98 : f32 to vector<8x128xf32>
    %274 = arith.mulf %273, %263 : vector<8x128xf32>
    %275 = arith.addf %242, %274 : vector<8x128xf32>
    %276 = vector.broadcast %114 : f32 to vector<8x128xf32>
    %277 = arith.mulf %276, %263 : vector<8x128xf32>
    %278 = arith.addf %245, %277 : vector<8x128xf32>
    %279 = vector.broadcast %130 : f32 to vector<8x128xf32>
    %280 = arith.mulf %279, %263 : vector<8x128xf32>
    %281 = arith.addf %248, %280 : vector<8x128xf32>
    %282 = vector.broadcast %146 : f32 to vector<8x128xf32>
    %283 = arith.mulf %282, %263 : vector<8x128xf32>
    %284 = arith.addf %251, %283 : vector<8x128xf32>
    %285 = vector.broadcast %162 : f32 to vector<8x128xf32>
    %286 = arith.mulf %285, %263 : vector<8x128xf32>
    %287 = arith.addf %254, %286 : vector<8x128xf32>
    %288 = vector.broadcast %6 : f32 to vector<8x128xf32>
    %289 = arith.mulf %288, %194 : vector<8x128xf32>
    %290 = vector.broadcast %7 : f32 to vector<8x128xf32>
    %291 = arith.mulf %290, %196 : vector<8x128xf32>
    %292 = arith.addf %289, %291 : vector<8x128xf32>
    %293 = vector.broadcast %35 : f32 to vector<8x128xf32>
    %294 = arith.addf %292, %293 : vector<8x128xf32>
    %cst_8 = arith.constant 0.000000e+00 : f32
    %295 = vector.broadcast %cst_8 : f32 to vector<8x128xf32>
    %296 = arith.maximumf %294, %295 : vector<8x128xf32>
    %297 = vector.broadcast %51 : f32 to vector<8x128xf32>
    %298 = arith.mulf %297, %296 : vector<8x128xf32>
    %299 = arith.addf %266, %298 : vector<8x128xf32>
    %300 = vector.broadcast %67 : f32 to vector<8x128xf32>
    %301 = arith.mulf %300, %296 : vector<8x128xf32>
    %302 = arith.addf %269, %301 : vector<8x128xf32>
    %303 = vector.broadcast %83 : f32 to vector<8x128xf32>
    %304 = arith.mulf %303, %296 : vector<8x128xf32>
    %305 = arith.addf %272, %304 : vector<8x128xf32>
    %306 = vector.broadcast %99 : f32 to vector<8x128xf32>
    %307 = arith.mulf %306, %296 : vector<8x128xf32>
    %308 = arith.addf %275, %307 : vector<8x128xf32>
    %309 = vector.broadcast %115 : f32 to vector<8x128xf32>
    %310 = arith.mulf %309, %296 : vector<8x128xf32>
    %311 = arith.addf %278, %310 : vector<8x128xf32>
    %312 = vector.broadcast %131 : f32 to vector<8x128xf32>
    %313 = arith.mulf %312, %296 : vector<8x128xf32>
    %314 = arith.addf %281, %313 : vector<8x128xf32>
    %315 = vector.broadcast %147 : f32 to vector<8x128xf32>
    %316 = arith.mulf %315, %296 : vector<8x128xf32>
    %317 = arith.addf %284, %316 : vector<8x128xf32>
    %318 = vector.broadcast %163 : f32 to vector<8x128xf32>
    %319 = arith.mulf %318, %296 : vector<8x128xf32>
    %320 = arith.addf %287, %319 : vector<8x128xf32>
    %321 = vector.broadcast %8 : f32 to vector<8x128xf32>
    %322 = arith.mulf %321, %194 : vector<8x128xf32>
    %323 = vector.broadcast %9 : f32 to vector<8x128xf32>
    %324 = arith.mulf %323, %196 : vector<8x128xf32>
    %325 = arith.addf %322, %324 : vector<8x128xf32>
    %326 = vector.broadcast %36 : f32 to vector<8x128xf32>
    %327 = arith.addf %325, %326 : vector<8x128xf32>
    %cst_9 = arith.constant 0.000000e+00 : f32
    %328 = vector.broadcast %cst_9 : f32 to vector<8x128xf32>
    %329 = arith.maximumf %327, %328 : vector<8x128xf32>
    %330 = vector.broadcast %52 : f32 to vector<8x128xf32>
    %331 = arith.mulf %330, %329 : vector<8x128xf32>
    %332 = arith.addf %299, %331 : vector<8x128xf32>
    %333 = vector.broadcast %68 : f32 to vector<8x128xf32>
    %334 = arith.mulf %333, %329 : vector<8x128xf32>
    %335 = arith.addf %302, %334 : vector<8x128xf32>
    %336 = vector.broadcast %84 : f32 to vector<8x128xf32>
    %337 = arith.mulf %336, %329 : vector<8x128xf32>
    %338 = arith.addf %305, %337 : vector<8x128xf32>
    %339 = vector.broadcast %100 : f32 to vector<8x128xf32>
    %340 = arith.mulf %339, %329 : vector<8x128xf32>
    %341 = arith.addf %308, %340 : vector<8x128xf32>
    %342 = vector.broadcast %116 : f32 to vector<8x128xf32>
    %343 = arith.mulf %342, %329 : vector<8x128xf32>
    %344 = arith.addf %311, %343 : vector<8x128xf32>
    %345 = vector.broadcast %132 : f32 to vector<8x128xf32>
    %346 = arith.mulf %345, %329 : vector<8x128xf32>
    %347 = arith.addf %314, %346 : vector<8x128xf32>
    %348 = vector.broadcast %148 : f32 to vector<8x128xf32>
    %349 = arith.mulf %348, %329 : vector<8x128xf32>
    %350 = arith.addf %317, %349 : vector<8x128xf32>
    %351 = vector.broadcast %164 : f32 to vector<8x128xf32>
    %352 = arith.mulf %351, %329 : vector<8x128xf32>
    %353 = arith.addf %320, %352 : vector<8x128xf32>
    %354 = vector.broadcast %10 : f32 to vector<8x128xf32>
    %355 = arith.mulf %354, %194 : vector<8x128xf32>
    %356 = vector.broadcast %11 : f32 to vector<8x128xf32>
    %357 = arith.mulf %356, %196 : vector<8x128xf32>
    %358 = arith.addf %355, %357 : vector<8x128xf32>
    %359 = vector.broadcast %37 : f32 to vector<8x128xf32>
    %360 = arith.addf %358, %359 : vector<8x128xf32>
    %cst_10 = arith.constant 0.000000e+00 : f32
    %361 = vector.broadcast %cst_10 : f32 to vector<8x128xf32>
    %362 = arith.maximumf %360, %361 : vector<8x128xf32>
    %363 = vector.broadcast %53 : f32 to vector<8x128xf32>
    %364 = arith.mulf %363, %362 : vector<8x128xf32>
    %365 = arith.addf %332, %364 : vector<8x128xf32>
    %366 = vector.broadcast %69 : f32 to vector<8x128xf32>
    %367 = arith.mulf %366, %362 : vector<8x128xf32>
    %368 = arith.addf %335, %367 : vector<8x128xf32>
    %369 = vector.broadcast %85 : f32 to vector<8x128xf32>
    %370 = arith.mulf %369, %362 : vector<8x128xf32>
    %371 = arith.addf %338, %370 : vector<8x128xf32>
    %372 = vector.broadcast %101 : f32 to vector<8x128xf32>
    %373 = arith.mulf %372, %362 : vector<8x128xf32>
    %374 = arith.addf %341, %373 : vector<8x128xf32>
    %375 = vector.broadcast %117 : f32 to vector<8x128xf32>
    %376 = arith.mulf %375, %362 : vector<8x128xf32>
    %377 = arith.addf %344, %376 : vector<8x128xf32>
    %378 = vector.broadcast %133 : f32 to vector<8x128xf32>
    %379 = arith.mulf %378, %362 : vector<8x128xf32>
    %380 = arith.addf %347, %379 : vector<8x128xf32>
    %381 = vector.broadcast %149 : f32 to vector<8x128xf32>
    %382 = arith.mulf %381, %362 : vector<8x128xf32>
    %383 = arith.addf %350, %382 : vector<8x128xf32>
    %384 = vector.broadcast %165 : f32 to vector<8x128xf32>
    %385 = arith.mulf %384, %362 : vector<8x128xf32>
    %386 = arith.addf %353, %385 : vector<8x128xf32>
    %387 = vector.broadcast %12 : f32 to vector<8x128xf32>
    %388 = arith.mulf %387, %194 : vector<8x128xf32>
    %389 = vector.broadcast %13 : f32 to vector<8x128xf32>
    %390 = arith.mulf %389, %196 : vector<8x128xf32>
    %391 = arith.addf %388, %390 : vector<8x128xf32>
    %392 = vector.broadcast %38 : f32 to vector<8x128xf32>
    %393 = arith.addf %391, %392 : vector<8x128xf32>
    %cst_11 = arith.constant 0.000000e+00 : f32
    %394 = vector.broadcast %cst_11 : f32 to vector<8x128xf32>
    %395 = arith.maximumf %393, %394 : vector<8x128xf32>
    %396 = vector.broadcast %54 : f32 to vector<8x128xf32>
    %397 = arith.mulf %396, %395 : vector<8x128xf32>
    %398 = arith.addf %365, %397 : vector<8x128xf32>
    %399 = vector.broadcast %70 : f32 to vector<8x128xf32>
    %400 = arith.mulf %399, %395 : vector<8x128xf32>
    %401 = arith.addf %368, %400 : vector<8x128xf32>
    %402 = vector.broadcast %86 : f32 to vector<8x128xf32>
    %403 = arith.mulf %402, %395 : vector<8x128xf32>
    %404 = arith.addf %371, %403 : vector<8x128xf32>
    %405 = vector.broadcast %102 : f32 to vector<8x128xf32>
    %406 = arith.mulf %405, %395 : vector<8x128xf32>
    %407 = arith.addf %374, %406 : vector<8x128xf32>
    %408 = vector.broadcast %118 : f32 to vector<8x128xf32>
    %409 = arith.mulf %408, %395 : vector<8x128xf32>
    %410 = arith.addf %377, %409 : vector<8x128xf32>
    %411 = vector.broadcast %134 : f32 to vector<8x128xf32>
    %412 = arith.mulf %411, %395 : vector<8x128xf32>
    %413 = arith.addf %380, %412 : vector<8x128xf32>
    %414 = vector.broadcast %150 : f32 to vector<8x128xf32>
    %415 = arith.mulf %414, %395 : vector<8x128xf32>
    %416 = arith.addf %383, %415 : vector<8x128xf32>
    %417 = vector.broadcast %166 : f32 to vector<8x128xf32>
    %418 = arith.mulf %417, %395 : vector<8x128xf32>
    %419 = arith.addf %386, %418 : vector<8x128xf32>
    %420 = vector.broadcast %14 : f32 to vector<8x128xf32>
    %421 = arith.mulf %420, %194 : vector<8x128xf32>
    %422 = vector.broadcast %15 : f32 to vector<8x128xf32>
    %423 = arith.mulf %422, %196 : vector<8x128xf32>
    %424 = arith.addf %421, %423 : vector<8x128xf32>
    %425 = vector.broadcast %39 : f32 to vector<8x128xf32>
    %426 = arith.addf %424, %425 : vector<8x128xf32>
    %cst_12 = arith.constant 0.000000e+00 : f32
    %427 = vector.broadcast %cst_12 : f32 to vector<8x128xf32>
    %428 = arith.maximumf %426, %427 : vector<8x128xf32>
    %429 = vector.broadcast %55 : f32 to vector<8x128xf32>
    %430 = arith.mulf %429, %428 : vector<8x128xf32>
    %431 = arith.addf %398, %430 : vector<8x128xf32>
    %432 = vector.broadcast %71 : f32 to vector<8x128xf32>
    %433 = arith.mulf %432, %428 : vector<8x128xf32>
    %434 = arith.addf %401, %433 : vector<8x128xf32>
    %435 = vector.broadcast %87 : f32 to vector<8x128xf32>
    %436 = arith.mulf %435, %428 : vector<8x128xf32>
    %437 = arith.addf %404, %436 : vector<8x128xf32>
    %438 = vector.broadcast %103 : f32 to vector<8x128xf32>
    %439 = arith.mulf %438, %428 : vector<8x128xf32>
    %440 = arith.addf %407, %439 : vector<8x128xf32>
    %441 = vector.broadcast %119 : f32 to vector<8x128xf32>
    %442 = arith.mulf %441, %428 : vector<8x128xf32>
    %443 = arith.addf %410, %442 : vector<8x128xf32>
    %444 = vector.broadcast %135 : f32 to vector<8x128xf32>
    %445 = arith.mulf %444, %428 : vector<8x128xf32>
    %446 = arith.addf %413, %445 : vector<8x128xf32>
    %447 = vector.broadcast %151 : f32 to vector<8x128xf32>
    %448 = arith.mulf %447, %428 : vector<8x128xf32>
    %449 = arith.addf %416, %448 : vector<8x128xf32>
    %450 = vector.broadcast %167 : f32 to vector<8x128xf32>
    %451 = arith.mulf %450, %428 : vector<8x128xf32>
    %452 = arith.addf %419, %451 : vector<8x128xf32>
    %453 = vector.broadcast %16 : f32 to vector<8x128xf32>
    %454 = arith.mulf %453, %194 : vector<8x128xf32>
    %455 = vector.broadcast %17 : f32 to vector<8x128xf32>
    %456 = arith.mulf %455, %196 : vector<8x128xf32>
    %457 = arith.addf %454, %456 : vector<8x128xf32>
    %458 = vector.broadcast %40 : f32 to vector<8x128xf32>
    %459 = arith.addf %457, %458 : vector<8x128xf32>
    %cst_13 = arith.constant 0.000000e+00 : f32
    %460 = vector.broadcast %cst_13 : f32 to vector<8x128xf32>
    %461 = arith.maximumf %459, %460 : vector<8x128xf32>
    %462 = vector.broadcast %56 : f32 to vector<8x128xf32>
    %463 = arith.mulf %462, %461 : vector<8x128xf32>
    %464 = arith.addf %431, %463 : vector<8x128xf32>
    %465 = vector.broadcast %72 : f32 to vector<8x128xf32>
    %466 = arith.mulf %465, %461 : vector<8x128xf32>
    %467 = arith.addf %434, %466 : vector<8x128xf32>
    %468 = vector.broadcast %88 : f32 to vector<8x128xf32>
    %469 = arith.mulf %468, %461 : vector<8x128xf32>
    %470 = arith.addf %437, %469 : vector<8x128xf32>
    %471 = vector.broadcast %104 : f32 to vector<8x128xf32>
    %472 = arith.mulf %471, %461 : vector<8x128xf32>
    %473 = arith.addf %440, %472 : vector<8x128xf32>
    %474 = vector.broadcast %120 : f32 to vector<8x128xf32>
    %475 = arith.mulf %474, %461 : vector<8x128xf32>
    %476 = arith.addf %443, %475 : vector<8x128xf32>
    %477 = vector.broadcast %136 : f32 to vector<8x128xf32>
    %478 = arith.mulf %477, %461 : vector<8x128xf32>
    %479 = arith.addf %446, %478 : vector<8x128xf32>
    %480 = vector.broadcast %152 : f32 to vector<8x128xf32>
    %481 = arith.mulf %480, %461 : vector<8x128xf32>
    %482 = arith.addf %449, %481 : vector<8x128xf32>
    %483 = vector.broadcast %168 : f32 to vector<8x128xf32>
    %484 = arith.mulf %483, %461 : vector<8x128xf32>
    %485 = arith.addf %452, %484 : vector<8x128xf32>
    %486 = vector.broadcast %18 : f32 to vector<8x128xf32>
    %487 = arith.mulf %486, %194 : vector<8x128xf32>
    %488 = vector.broadcast %19 : f32 to vector<8x128xf32>
    %489 = arith.mulf %488, %196 : vector<8x128xf32>
    %490 = arith.addf %487, %489 : vector<8x128xf32>
    %491 = vector.broadcast %41 : f32 to vector<8x128xf32>
    %492 = arith.addf %490, %491 : vector<8x128xf32>
    %cst_14 = arith.constant 0.000000e+00 : f32
    %493 = vector.broadcast %cst_14 : f32 to vector<8x128xf32>
    %494 = arith.maximumf %492, %493 : vector<8x128xf32>
    %495 = vector.broadcast %57 : f32 to vector<8x128xf32>
    %496 = arith.mulf %495, %494 : vector<8x128xf32>
    %497 = arith.addf %464, %496 : vector<8x128xf32>
    %498 = vector.broadcast %73 : f32 to vector<8x128xf32>
    %499 = arith.mulf %498, %494 : vector<8x128xf32>
    %500 = arith.addf %467, %499 : vector<8x128xf32>
    %501 = vector.broadcast %89 : f32 to vector<8x128xf32>
    %502 = arith.mulf %501, %494 : vector<8x128xf32>
    %503 = arith.addf %470, %502 : vector<8x128xf32>
    %504 = vector.broadcast %105 : f32 to vector<8x128xf32>
    %505 = arith.mulf %504, %494 : vector<8x128xf32>
    %506 = arith.addf %473, %505 : vector<8x128xf32>
    %507 = vector.broadcast %121 : f32 to vector<8x128xf32>
    %508 = arith.mulf %507, %494 : vector<8x128xf32>
    %509 = arith.addf %476, %508 : vector<8x128xf32>
    %510 = vector.broadcast %137 : f32 to vector<8x128xf32>
    %511 = arith.mulf %510, %494 : vector<8x128xf32>
    %512 = arith.addf %479, %511 : vector<8x128xf32>
    %513 = vector.broadcast %153 : f32 to vector<8x128xf32>
    %514 = arith.mulf %513, %494 : vector<8x128xf32>
    %515 = arith.addf %482, %514 : vector<8x128xf32>
    %516 = vector.broadcast %169 : f32 to vector<8x128xf32>
    %517 = arith.mulf %516, %494 : vector<8x128xf32>
    %518 = arith.addf %485, %517 : vector<8x128xf32>
    %519 = vector.broadcast %20 : f32 to vector<8x128xf32>
    %520 = arith.mulf %519, %194 : vector<8x128xf32>
    %521 = vector.broadcast %21 : f32 to vector<8x128xf32>
    %522 = arith.mulf %521, %196 : vector<8x128xf32>
    %523 = arith.addf %520, %522 : vector<8x128xf32>
    %524 = vector.broadcast %42 : f32 to vector<8x128xf32>
    %525 = arith.addf %523, %524 : vector<8x128xf32>
    %cst_15 = arith.constant 0.000000e+00 : f32
    %526 = vector.broadcast %cst_15 : f32 to vector<8x128xf32>
    %527 = arith.maximumf %525, %526 : vector<8x128xf32>
    %528 = vector.broadcast %58 : f32 to vector<8x128xf32>
    %529 = arith.mulf %528, %527 : vector<8x128xf32>
    %530 = arith.addf %497, %529 : vector<8x128xf32>
    %531 = vector.broadcast %74 : f32 to vector<8x128xf32>
    %532 = arith.mulf %531, %527 : vector<8x128xf32>
    %533 = arith.addf %500, %532 : vector<8x128xf32>
    %534 = vector.broadcast %90 : f32 to vector<8x128xf32>
    %535 = arith.mulf %534, %527 : vector<8x128xf32>
    %536 = arith.addf %503, %535 : vector<8x128xf32>
    %537 = vector.broadcast %106 : f32 to vector<8x128xf32>
    %538 = arith.mulf %537, %527 : vector<8x128xf32>
    %539 = arith.addf %506, %538 : vector<8x128xf32>
    %540 = vector.broadcast %122 : f32 to vector<8x128xf32>
    %541 = arith.mulf %540, %527 : vector<8x128xf32>
    %542 = arith.addf %509, %541 : vector<8x128xf32>
    %543 = vector.broadcast %138 : f32 to vector<8x128xf32>
    %544 = arith.mulf %543, %527 : vector<8x128xf32>
    %545 = arith.addf %512, %544 : vector<8x128xf32>
    %546 = vector.broadcast %154 : f32 to vector<8x128xf32>
    %547 = arith.mulf %546, %527 : vector<8x128xf32>
    %548 = arith.addf %515, %547 : vector<8x128xf32>
    %549 = vector.broadcast %170 : f32 to vector<8x128xf32>
    %550 = arith.mulf %549, %527 : vector<8x128xf32>
    %551 = arith.addf %518, %550 : vector<8x128xf32>
    %552 = vector.broadcast %22 : f32 to vector<8x128xf32>
    %553 = arith.mulf %552, %194 : vector<8x128xf32>
    %554 = vector.broadcast %23 : f32 to vector<8x128xf32>
    %555 = arith.mulf %554, %196 : vector<8x128xf32>
    %556 = arith.addf %553, %555 : vector<8x128xf32>
    %557 = vector.broadcast %43 : f32 to vector<8x128xf32>
    %558 = arith.addf %556, %557 : vector<8x128xf32>
    %cst_16 = arith.constant 0.000000e+00 : f32
    %559 = vector.broadcast %cst_16 : f32 to vector<8x128xf32>
    %560 = arith.maximumf %558, %559 : vector<8x128xf32>
    %561 = vector.broadcast %59 : f32 to vector<8x128xf32>
    %562 = arith.mulf %561, %560 : vector<8x128xf32>
    %563 = arith.addf %530, %562 : vector<8x128xf32>
    %564 = vector.broadcast %75 : f32 to vector<8x128xf32>
    %565 = arith.mulf %564, %560 : vector<8x128xf32>
    %566 = arith.addf %533, %565 : vector<8x128xf32>
    %567 = vector.broadcast %91 : f32 to vector<8x128xf32>
    %568 = arith.mulf %567, %560 : vector<8x128xf32>
    %569 = arith.addf %536, %568 : vector<8x128xf32>
    %570 = vector.broadcast %107 : f32 to vector<8x128xf32>
    %571 = arith.mulf %570, %560 : vector<8x128xf32>
    %572 = arith.addf %539, %571 : vector<8x128xf32>
    %573 = vector.broadcast %123 : f32 to vector<8x128xf32>
    %574 = arith.mulf %573, %560 : vector<8x128xf32>
    %575 = arith.addf %542, %574 : vector<8x128xf32>
    %576 = vector.broadcast %139 : f32 to vector<8x128xf32>
    %577 = arith.mulf %576, %560 : vector<8x128xf32>
    %578 = arith.addf %545, %577 : vector<8x128xf32>
    %579 = vector.broadcast %155 : f32 to vector<8x128xf32>
    %580 = arith.mulf %579, %560 : vector<8x128xf32>
    %581 = arith.addf %548, %580 : vector<8x128xf32>
    %582 = vector.broadcast %171 : f32 to vector<8x128xf32>
    %583 = arith.mulf %582, %560 : vector<8x128xf32>
    %584 = arith.addf %551, %583 : vector<8x128xf32>
    %585 = vector.broadcast %24 : f32 to vector<8x128xf32>
    %586 = arith.mulf %585, %194 : vector<8x128xf32>
    %587 = vector.broadcast %25 : f32 to vector<8x128xf32>
    %588 = arith.mulf %587, %196 : vector<8x128xf32>
    %589 = arith.addf %586, %588 : vector<8x128xf32>
    %590 = vector.broadcast %44 : f32 to vector<8x128xf32>
    %591 = arith.addf %589, %590 : vector<8x128xf32>
    %cst_17 = arith.constant 0.000000e+00 : f32
    %592 = vector.broadcast %cst_17 : f32 to vector<8x128xf32>
    %593 = arith.maximumf %591, %592 : vector<8x128xf32>
    %594 = vector.broadcast %60 : f32 to vector<8x128xf32>
    %595 = arith.mulf %594, %593 : vector<8x128xf32>
    %596 = arith.addf %563, %595 : vector<8x128xf32>
    %597 = vector.broadcast %76 : f32 to vector<8x128xf32>
    %598 = arith.mulf %597, %593 : vector<8x128xf32>
    %599 = arith.addf %566, %598 : vector<8x128xf32>
    %600 = vector.broadcast %92 : f32 to vector<8x128xf32>
    %601 = arith.mulf %600, %593 : vector<8x128xf32>
    %602 = arith.addf %569, %601 : vector<8x128xf32>
    %603 = vector.broadcast %108 : f32 to vector<8x128xf32>
    %604 = arith.mulf %603, %593 : vector<8x128xf32>
    %605 = arith.addf %572, %604 : vector<8x128xf32>
    %606 = vector.broadcast %124 : f32 to vector<8x128xf32>
    %607 = arith.mulf %606, %593 : vector<8x128xf32>
    %608 = arith.addf %575, %607 : vector<8x128xf32>
    %609 = vector.broadcast %140 : f32 to vector<8x128xf32>
    %610 = arith.mulf %609, %593 : vector<8x128xf32>
    %611 = arith.addf %578, %610 : vector<8x128xf32>
    %612 = vector.broadcast %156 : f32 to vector<8x128xf32>
    %613 = arith.mulf %612, %593 : vector<8x128xf32>
    %614 = arith.addf %581, %613 : vector<8x128xf32>
    %615 = vector.broadcast %172 : f32 to vector<8x128xf32>
    %616 = arith.mulf %615, %593 : vector<8x128xf32>
    %617 = arith.addf %584, %616 : vector<8x128xf32>
    %618 = vector.broadcast %26 : f32 to vector<8x128xf32>
    %619 = arith.mulf %618, %194 : vector<8x128xf32>
    %620 = vector.broadcast %27 : f32 to vector<8x128xf32>
    %621 = arith.mulf %620, %196 : vector<8x128xf32>
    %622 = arith.addf %619, %621 : vector<8x128xf32>
    %623 = vector.broadcast %45 : f32 to vector<8x128xf32>
    %624 = arith.addf %622, %623 : vector<8x128xf32>
    %cst_18 = arith.constant 0.000000e+00 : f32
    %625 = vector.broadcast %cst_18 : f32 to vector<8x128xf32>
    %626 = arith.maximumf %624, %625 : vector<8x128xf32>
    %627 = vector.broadcast %61 : f32 to vector<8x128xf32>
    %628 = arith.mulf %627, %626 : vector<8x128xf32>
    %629 = arith.addf %596, %628 : vector<8x128xf32>
    %630 = vector.broadcast %77 : f32 to vector<8x128xf32>
    %631 = arith.mulf %630, %626 : vector<8x128xf32>
    %632 = arith.addf %599, %631 : vector<8x128xf32>
    %633 = vector.broadcast %93 : f32 to vector<8x128xf32>
    %634 = arith.mulf %633, %626 : vector<8x128xf32>
    %635 = arith.addf %602, %634 : vector<8x128xf32>
    %636 = vector.broadcast %109 : f32 to vector<8x128xf32>
    %637 = arith.mulf %636, %626 : vector<8x128xf32>
    %638 = arith.addf %605, %637 : vector<8x128xf32>
    %639 = vector.broadcast %125 : f32 to vector<8x128xf32>
    %640 = arith.mulf %639, %626 : vector<8x128xf32>
    %641 = arith.addf %608, %640 : vector<8x128xf32>
    %642 = vector.broadcast %141 : f32 to vector<8x128xf32>
    %643 = arith.mulf %642, %626 : vector<8x128xf32>
    %644 = arith.addf %611, %643 : vector<8x128xf32>
    %645 = vector.broadcast %157 : f32 to vector<8x128xf32>
    %646 = arith.mulf %645, %626 : vector<8x128xf32>
    %647 = arith.addf %614, %646 : vector<8x128xf32>
    %648 = vector.broadcast %173 : f32 to vector<8x128xf32>
    %649 = arith.mulf %648, %626 : vector<8x128xf32>
    %650 = arith.addf %617, %649 : vector<8x128xf32>
    %651 = vector.broadcast %28 : f32 to vector<8x128xf32>
    %652 = arith.mulf %651, %194 : vector<8x128xf32>
    %653 = vector.broadcast %29 : f32 to vector<8x128xf32>
    %654 = arith.mulf %653, %196 : vector<8x128xf32>
    %655 = arith.addf %652, %654 : vector<8x128xf32>
    %656 = vector.broadcast %46 : f32 to vector<8x128xf32>
    %657 = arith.addf %655, %656 : vector<8x128xf32>
    %cst_19 = arith.constant 0.000000e+00 : f32
    %658 = vector.broadcast %cst_19 : f32 to vector<8x128xf32>
    %659 = arith.maximumf %657, %658 : vector<8x128xf32>
    %660 = vector.broadcast %62 : f32 to vector<8x128xf32>
    %661 = arith.mulf %660, %659 : vector<8x128xf32>
    %662 = arith.addf %629, %661 : vector<8x128xf32>
    %663 = vector.broadcast %78 : f32 to vector<8x128xf32>
    %664 = arith.mulf %663, %659 : vector<8x128xf32>
    %665 = arith.addf %632, %664 : vector<8x128xf32>
    %666 = vector.broadcast %94 : f32 to vector<8x128xf32>
    %667 = arith.mulf %666, %659 : vector<8x128xf32>
    %668 = arith.addf %635, %667 : vector<8x128xf32>
    %669 = vector.broadcast %110 : f32 to vector<8x128xf32>
    %670 = arith.mulf %669, %659 : vector<8x128xf32>
    %671 = arith.addf %638, %670 : vector<8x128xf32>
    %672 = vector.broadcast %126 : f32 to vector<8x128xf32>
    %673 = arith.mulf %672, %659 : vector<8x128xf32>
    %674 = arith.addf %641, %673 : vector<8x128xf32>
    %675 = vector.broadcast %142 : f32 to vector<8x128xf32>
    %676 = arith.mulf %675, %659 : vector<8x128xf32>
    %677 = arith.addf %644, %676 : vector<8x128xf32>
    %678 = vector.broadcast %158 : f32 to vector<8x128xf32>
    %679 = arith.mulf %678, %659 : vector<8x128xf32>
    %680 = arith.addf %647, %679 : vector<8x128xf32>
    %681 = vector.broadcast %174 : f32 to vector<8x128xf32>
    %682 = arith.mulf %681, %659 : vector<8x128xf32>
    %683 = arith.addf %650, %682 : vector<8x128xf32>
    %684 = vector.broadcast %30 : f32 to vector<8x128xf32>
    %685 = arith.mulf %684, %194 : vector<8x128xf32>
    %686 = vector.broadcast %31 : f32 to vector<8x128xf32>
    %687 = arith.mulf %686, %196 : vector<8x128xf32>
    %688 = arith.addf %685, %687 : vector<8x128xf32>
    %689 = vector.broadcast %47 : f32 to vector<8x128xf32>
    %690 = arith.addf %688, %689 : vector<8x128xf32>
    %cst_20 = arith.constant 0.000000e+00 : f32
    %691 = vector.broadcast %cst_20 : f32 to vector<8x128xf32>
    %692 = arith.maximumf %690, %691 : vector<8x128xf32>
    %693 = vector.broadcast %63 : f32 to vector<8x128xf32>
    %694 = arith.mulf %693, %692 : vector<8x128xf32>
    %695 = arith.addf %662, %694 : vector<8x128xf32>
    %696 = vector.broadcast %79 : f32 to vector<8x128xf32>
    %697 = arith.mulf %696, %692 : vector<8x128xf32>
    %698 = arith.addf %665, %697 : vector<8x128xf32>
    %699 = vector.broadcast %95 : f32 to vector<8x128xf32>
    %700 = arith.mulf %699, %692 : vector<8x128xf32>
    %701 = arith.addf %668, %700 : vector<8x128xf32>
    %702 = vector.broadcast %111 : f32 to vector<8x128xf32>
    %703 = arith.mulf %702, %692 : vector<8x128xf32>
    %704 = arith.addf %671, %703 : vector<8x128xf32>
    %705 = vector.broadcast %127 : f32 to vector<8x128xf32>
    %706 = arith.mulf %705, %692 : vector<8x128xf32>
    %707 = arith.addf %674, %706 : vector<8x128xf32>
    %708 = vector.broadcast %143 : f32 to vector<8x128xf32>
    %709 = arith.mulf %708, %692 : vector<8x128xf32>
    %710 = arith.addf %677, %709 : vector<8x128xf32>
    %711 = vector.broadcast %159 : f32 to vector<8x128xf32>
    %712 = arith.mulf %711, %692 : vector<8x128xf32>
    %713 = arith.addf %680, %712 : vector<8x128xf32>
    %714 = vector.broadcast %175 : f32 to vector<8x128xf32>
    %715 = arith.mulf %714, %692 : vector<8x128xf32>
    %716 = arith.addf %683, %715 : vector<8x128xf32>
    %717 = vector.broadcast %176 : f32 to vector<8x128xf32>
    %718 = arith.addf %695, %717 : vector<8x128xf32>
    %cst_21 = arith.constant 0.000000e+00 : f32
    %719 = vector.broadcast %cst_21 : f32 to vector<8x128xf32>
    %720 = arith.maximumf %718, %719 : vector<8x128xf32>
    %721 = vector.broadcast %184 : f32 to vector<8x128xf32>
    %722 = arith.mulf %721, %720 : vector<8x128xf32>
    %723 = vector.broadcast %177 : f32 to vector<8x128xf32>
    %724 = arith.addf %698, %723 : vector<8x128xf32>
    %cst_22 = arith.constant 0.000000e+00 : f32
    %725 = vector.broadcast %cst_22 : f32 to vector<8x128xf32>
    %726 = arith.maximumf %724, %725 : vector<8x128xf32>
    %727 = vector.broadcast %185 : f32 to vector<8x128xf32>
    %728 = arith.mulf %727, %726 : vector<8x128xf32>
    %729 = arith.addf %722, %728 : vector<8x128xf32>
    %730 = vector.broadcast %178 : f32 to vector<8x128xf32>
    %731 = arith.addf %701, %730 : vector<8x128xf32>
    %cst_23 = arith.constant 0.000000e+00 : f32
    %732 = vector.broadcast %cst_23 : f32 to vector<8x128xf32>
    %733 = arith.maximumf %731, %732 : vector<8x128xf32>
    %734 = vector.broadcast %186 : f32 to vector<8x128xf32>
    %735 = arith.mulf %734, %733 : vector<8x128xf32>
    %736 = arith.addf %729, %735 : vector<8x128xf32>
    %737 = vector.broadcast %179 : f32 to vector<8x128xf32>
    %738 = arith.addf %704, %737 : vector<8x128xf32>
    %cst_24 = arith.constant 0.000000e+00 : f32
    %739 = vector.broadcast %cst_24 : f32 to vector<8x128xf32>
    %740 = arith.maximumf %738, %739 : vector<8x128xf32>
    %741 = vector.broadcast %187 : f32 to vector<8x128xf32>
    %742 = arith.mulf %741, %740 : vector<8x128xf32>
    %743 = arith.addf %736, %742 : vector<8x128xf32>
    %744 = vector.broadcast %180 : f32 to vector<8x128xf32>
    %745 = arith.addf %707, %744 : vector<8x128xf32>
    %cst_25 = arith.constant 0.000000e+00 : f32
    %746 = vector.broadcast %cst_25 : f32 to vector<8x128xf32>
    %747 = arith.maximumf %745, %746 : vector<8x128xf32>
    %748 = vector.broadcast %188 : f32 to vector<8x128xf32>
    %749 = arith.mulf %748, %747 : vector<8x128xf32>
    %750 = arith.addf %743, %749 : vector<8x128xf32>
    %751 = vector.broadcast %181 : f32 to vector<8x128xf32>
    %752 = arith.addf %710, %751 : vector<8x128xf32>
    %cst_26 = arith.constant 0.000000e+00 : f32
    %753 = vector.broadcast %cst_26 : f32 to vector<8x128xf32>
    %754 = arith.maximumf %752, %753 : vector<8x128xf32>
    %755 = vector.broadcast %189 : f32 to vector<8x128xf32>
    %756 = arith.mulf %755, %754 : vector<8x128xf32>
    %757 = arith.addf %750, %756 : vector<8x128xf32>
    %758 = vector.broadcast %182 : f32 to vector<8x128xf32>
    %759 = arith.addf %713, %758 : vector<8x128xf32>
    %cst_27 = arith.constant 0.000000e+00 : f32
    %760 = vector.broadcast %cst_27 : f32 to vector<8x128xf32>
    %761 = arith.maximumf %759, %760 : vector<8x128xf32>
    %762 = vector.broadcast %190 : f32 to vector<8x128xf32>
    %763 = arith.mulf %762, %761 : vector<8x128xf32>
    %764 = arith.addf %757, %763 : vector<8x128xf32>
    %765 = vector.broadcast %183 : f32 to vector<8x128xf32>
    %766 = arith.addf %716, %765 : vector<8x128xf32>
    %cst_28 = arith.constant 0.000000e+00 : f32
    %767 = vector.broadcast %cst_28 : f32 to vector<8x128xf32>
    %768 = arith.maximumf %766, %767 : vector<8x128xf32>
    %769 = vector.broadcast %191 : f32 to vector<8x128xf32>
    %770 = arith.mulf %769, %768 : vector<8x128xf32>
    %771 = arith.addf %764, %770 : vector<8x128xf32>
    %772 = vector.broadcast %192 : f32 to vector<8x128xf32>
    %773 = arith.addf %771, %772 : vector<8x128xf32>
    %c0_29 = arith.constant 0 : index
    %c0_30 = arith.constant 0 : index
    %774 = vector.load %arg3[%c0_29, %c0_30] : memref<8x128xf32, #tpu.memory_space<vmem>>, vector<8x128xf32>
    tpu.vector_store %arg3[%c0_29, %c0_30], %773 {strides = array<i32>} : memref<8x128xf32, #tpu.memory_space<vmem>>, vector<8x128xf32>,
    return
  }
  func.func @transform_0(%arg0: i32) -> i32 {
    %c0_i32 = arith.constant 0 : i32
    %c0_i32_0 = arith.constant 0 : i32
    return %c0_i32 : i32
  }
  func.func @transform_1(%arg0: i32) -> (i32, i32, i32) {
    %c0_i32 = arith.constant 0 : i32
    %c0_i32_0 = arith.constant 0 : i32
    %c0_i32_1 = arith.constant 0 : i32
    return %c0_i32, %arg0, %c0_i32_0 : i32, i32, i32
  }
  func.func @transform_2(%arg0: i32) -> (i32, i32) {
    %c0_i32 = arith.constant 0 : i32
    %c0_i32_0 = arith.constant 0 : i32
    return %arg0, %c0_i32 : i32, i32
  }
}

</mosaic_0001>

<bundles_post_ra>
// kernel: tpu_custom_call.1
= control target key start
LH: loop header
LB: loop body
LE: loop exit
PB: predicated region body
PF: predicated region fallthrough
CT: control target
= control target key end

     0   :  { %7 = vsyncpa [#allocation5], 0  ;;  %s1933_s0 = inlined_call_operand.hbm [shape: f32[193], index: 0, kind: input, shape index: {}]   ;;  %s1934_s1 = inlined_call_operand.hbm [shape: f32[2,8,128], index: 1, kind: input, shape index: {}]   ;;  %s1935_s2 = inlined_call_operand.hbm [shape: f32[8,128], index: 2, kind: output, shape index: {}]  }
   0x1   :  { %8 = vsyncpa [#allocation3], 0 }
   0x2   :  { %9 = vsyncpa [#allocation4], 0  ;;  %s1002_s11 = scalar_lea.hbm %s1933_s0, 32 }
   0x3   :  { %p1003_p0 = scmp.ne.s32.totalorder %s1933_s0, %s1002_s11  ;;  %p1006_p1 = scmp.lt.u32.totalorder %s1002_s11, %s1933_s0 }
   0x5   :  { %p1008_p2 = pnand %p1006_p1, %p1003_p0 }
   0x7   :  { %1011 = shalt.err (!%p1008_p2)
}
   0x8   :  { %s1062_s16 = smov [#allocation2]   ;;  %s1063_s19 = smov [#allocation6]  }
   0x9   :  { %17 = dma.hbm_to_smem %s1933_s0, 32, %s1062_s16, [#allocation5]  }
   0xa   :  { %s23_s20 = sshll.u32 %s1063_s19, 4  ;;  %s1012_s23 = scalar_lea.hbm %s1934_s1, 256  ;;  %s24_s20 = int_to_ptr.vmem [resolvable:$true] %s23_s20 }
   0xb   :  { %p1013_p3 = scmp.ne.s32.totalorder %s1934_s1, %s1012_s23  ;;  %p1016_p4 = scmp.lt.u32.totalorder %s1012_s23, %s1934_s1 }
   0xd   :  { %p1018_p5 = pnand %p1016_p4, %p1013_p3 }
   0xf   :  { %1021 = shalt.err (!%p1018_p5)
}
  0x10   :  { %s1022_s28 = scalar_lea.vmem %s24_s20, 256  ;;  %p1027_p7 = scmp.lt.s32.totalorder %s24_s20, %s24_s20 }
  0x11   :  { %p1023_p6 = scmp.ne.s32.totalorder %s24_s20, %s1022_s28  ;;  %p1028_p8 = scmp.lt.s32.totalorder %s1022_s28, %s1022_s28 }
  0x13   :  { %p1029_p9 = por %p1028_p8, %p1027_p7 }
  0x15   :  { %p1030_p10 = pnand %p1029_p9, %p1023_p6 }
  0x17   :  { %1033 = shalt.err (!%p1030_p10)
}
  0x18   :  { %s1064_s0 = smov 128   ;;  %s1065_s29 = smov 8  }
  0x19   :  { %29 = dma.hbm_to_vmem [thread:$0]  %s1934_s1, 256, %s24_s20, [#allocation3], %s1064_s0, %s1064_s0, %s1065_s29  }
  0x1a   :  { %1056 = dma.done.wait [#allocation5], 32  }
  0x1b   :  { %1057 = vsyncadd [#allocation5], 4294967264 }
  0x1c   :  { %1058 = dma.done.wait [#allocation3], 256  }
  0x1d   :  { %1059 = vsyncadd [#allocation3], 4294967040 }
  0x1e   :  { %36 = sfence }
  0x1f   :  { %s37_s4 = sld [smem:[#allocation2]]  ;;  %s1106_s5 = sld [smem:[#allocation2 + $0x1]]  ;;  %v1132_v0 = vld [vmem:[#allocation6] sm:$0xff]  ;;  %v1142_v2 = vld [vmem:[#allocation6 + $0x8] sm:$0xff] }
  0x20   :  { %s1108_s6 = sld [smem:[#allocation2 + $0x2]]  ;;  %s1110_s7 = sld [smem:[#allocation2 + $0x3]] }
  0x21   :  { %s1112_s8 = sld [smem:[#allocation2 + $0x4]]  ;;  %s1114_s9 = sld [smem:[#allocation2 + $0x5]] }
  0x22   :  { %s1116_s10 = sld [smem:[#allocation2 + $0x6]]  ;;  %s1118_s1 = sld [smem:[#allocation2 + $0x7]] }
  0x23   :  { %s1120_s11 = sld [smem:[#allocation2 + $0x8]]  ;;  %s1122_s12 = sld [smem:[#allocation2 + $0x9]] }
  0x24   :  { %s1124_s13 = sld [smem:[#allocation2 + $0xa]]  ;;  %s1126_s14 = sld [smem:[#allocation2 + $0xb]] }
  0x25   :  { %s1128_s15 = sld [smem:[#allocation2 + $0xc]]  ;;  %s1130_s16 = sld [smem:[#allocation2 + $0xd]]  ;;  %v233_v1 = vstv %s37_s4  ;;  %v235_v3 = vstv %s1106_s5 }
  0x26   :  { %s1134_s17 = sld [smem:[#allocation2 + $0xe]]  ;;  %s1136_s18 = sld [smem:[#allocation2 + $0xf]]  ;;  %v257_v4 = vstv %s1108_s6  ;;  %v259_v5 = vstv %s1110_s7  ;;  %v234_v6 = vmul.f32 %v233_v1, %v1132_v0  ;;  %v236_v12 = vmul.f32 %v235_v3, %v1142_v2 }
  0x27   :  { %s1138_s19 = sld [smem:[#allocation2 + $0x10]]  ;;  %s1140_s20 = sld [smem:[#allocation2 + $0x11]]  ;;  %v289_v7 = vstv %s1112_s8  ;;  %v291_v8 = vstv %s1114_s9  ;;  %v258_v13 = vmul.f32 %v257_v4, %v1132_v0  ;;  %v260_v14 = vmul.f32 %v259_v5, %v1142_v2 }
  0x28   :  { %s1147_s21 = sld [smem:[#allocation2 + $0x12]]  ;;  %s1149_s22 = sld [smem:[#allocation2 + $0x13]]  ;;  %v321_v9 = vstv %s1116_s10  ;;  %v323_v10 = vstv %s1118_s1  ;;  %v290_v16 = vmul.f32 %v289_v7, %v1132_v0  ;;  %v292_v20 = vmul.f32 %v291_v8, %v1142_v2 }
  0x29   :  { %s1153_s23 = sld [smem:[#allocation2 + $0x14]]  ;;  %s1155_s24 = sld [smem:[#allocation2 + $0x15]]  ;;  %v353_v11 = vstv %s1120_s11  ;;  %v355_v15 = vstv %s1122_s12  ;;  %v322_v21 = vmul.f32 %v321_v9, %v1132_v0  ;;  %v324_v22 = vmul.f32 %v323_v10, %v1142_v2 }
  0x2a   :  { %v385_v17 = vstv %s1124_s13  ;;  %v387_v18 = vstv %s1126_s14  ;;  %v354_v23 = vmul.f32 %v353_v11, %v1132_v0  ;;  %s1173_s25 = sld [smem:[#allocation2 + $0x16]]  ;;  %s1175_s26 = sld [smem:[#allocation2 + $0x17]]  ;;  %v356_v24 = vmul.f32 %v355_v15, %v1142_v2 }
  0x2b   :  { %v417_v19 = vstv %s1128_s15  ;;  %v419_v25 = vstv %s1130_s16  ;;  %s1181_s27 = sld [smem:[#allocation2 + $0x18]]  ;;  %v386_v28 = vmul.f32 %v385_v17, %v1132_v0  ;;  %v388_v29 = vmul.f32 %v387_v18, %v1142_v2  ;;  %s1189_s0 = sld [smem:[#allocation2 + $0x21]] }
  0x2c   :  { %v449_v26 = vstv %s1134_s17  ;;  %v451_v27 = vstv %s1136_s18  ;;  %v418_v30 = vmul.f32 %v417_v19, %v1132_v0  ;;  %v420_v31 = vmul.f32 %v419_v25, %v1142_v2  ;;  %s1187_s28 = sld [smem:[#allocation2 + $0x20]]  ;;  %s1195_s29 = sld [smem:[#allocation2 + $0x22]] }
  0x2d   :  { %v450_v32 = vmul.f32 %v449_v26, %v1132_v0  ;;  %v452_v33 = vmul.f32 %v451_v27, %v1142_v2  ;;  %v481_v34 = vstv %s1138_s19  ;;  %v483_v35 = vstv %s1140_s20  ;;  %s1197_s30 = sld [smem:[#allocation2 + $0x23]]  ;;  %s1202_s3 = sld [smem:[#allocation2 + $0x24]] }
  0x2e   :  { %v482_v36 = vmul.f32 %v481_v34, %v1132_v0  ;;  %v484_v37 = vmul.f32 %v483_v35, %v1142_v2  ;;  %v513_v38 = vstv %s1147_s21  ;;  %s1204_s4 = sld [smem:[#allocation2 + $0x25]]  ;;  %v237_v39 = vadd.f32 %v236_v12, %v234_v6  ;;  %s1209_s5 = sld [smem:[#allocation2 + $0x26]] }
  0x2f   :  { %v515_v40 = vstv %s1149_s22  ;;  %v545_v41 = vstv %s1153_s23  ;;  %v547_v42 = vstv %s1155_s24  ;;  %s1211_s6 = sld [smem:[#allocation2 + $0x27]]  ;;  %v261_v43 = vadd.f32 %v260_v14, %v258_v13  ;;  %s1213_s7 = sld [smem:[#allocation2 + $0x19]] }
  0x30   :  { %v293_v44 = vadd.f32 %v292_v20, %v290_v16  ;;  %v325_v45 = vadd.f32 %v324_v22, %v322_v21  ;;  %v357_v46 = vadd.f32 %v356_v24, %v354_v23  ;;  %v389_v47 = vadd.f32 %v388_v29, %v386_v28  ;;  %s1216_s8 = sld [smem:[#allocation2 + $0x28]]  ;;  %s1218_s9 = sld [smem:[#allocation2 + $0x29]] }
  0x31   :  { %v421_v48 = vadd.f32 %v420_v31, %v418_v30  ;;  %v453_v49 = vadd.f32 %v452_v33, %v450_v32  ;;  %v514_v50 = vmul.f32 %v513_v38, %v1132_v0  ;;  %v485_v51 = vadd.f32 %v484_v37, %v482_v36  ;;  %s1223_s10 = sld [smem:[#allocation2 + $0x2a]]  ;;  %s1233_s11 = sld [smem:[#allocation2 + $0x30]] }
  0x32   :  { %v516_v52 = vmul.f32 %v515_v40, %v1142_v2  ;;  %v546_v53 = vmul.f32 %v545_v41, %v1132_v0  ;;  %v548_v54 = vmul.f32 %v547_v42, %v1142_v2  ;;  %v238_v55 = vstv %s1187_s28  ;;  %s1229_s1 = sld [smem:[#allocation2 + $0x1a]]  ;;  %s1235_s12 = sld [smem:[#allocation2 + $0x31]] }
  0x33   :  { %v262_v56 = vstv %s1189_s0  ;;  %v577_v57 = vstv %s1173_s25  ;;  %v579_v58 = vstv %s1175_s26  ;;  %v239_v59 = vadd.f32 %v238_v55, %v237_v39  ;;  %s1239_s13 = sld [smem:[#allocation2 + $0x32]]  ;;  %s1241_s14 = sld [smem:[#allocation2 + $0x33]] }
  0x34   :  { %v263_v60 = vadd.f32 %v262_v56, %v261_v43  ;;  %v294_v61 = vstv %s1195_s29  ;;  %v326_v62 = vstv %s1197_s30  ;;  %v358_v3 = vstv %s1202_s3  ;;  %s1244_s15 = sld [smem:[#allocation2 + $0x34]]  ;;  %s1246_s16 = sld [smem:[#allocation2 + $0x35]] }
  0x35   :  { %v295_v63 = vadd.f32 %v294_v61, %v293_v44  ;;  %v327_v1 = vadd.f32 %v326_v62, %v325_v45  ;;  %v390_v4 = vstv %s1204_s4  ;;  %v359_v5 = vadd.f32 %v358_v3, %v357_v46  ;;  %s1251_s17 = sld [smem:[#allocation2 + $0x2b]]  ;;  %s1253_s18 = sld [smem:[#allocation2 + $0x36]] }
  0x36   :  { %v391_v6 = vadd.f32 %v390_v4, %v389_v47  ;;  %v517_v7 = vadd.f32 %v516_v52, %v514_v50  ;;  %v578_v8 = vmul.f32 %v577_v57, %v1132_v0  ;;  %v422_v9 = vstv %s1209_s5  ;;  %s1260_s19 = sld [smem:[#allocation2 + $0x37]]  ;;  %s1269_s20 = sld [smem:[#allocation2 + $0x38]] }
  0x37   :  { %v454_v10 = vstv %s1211_s6  ;;  %v549_v11 = vadd.f32 %v548_v54, %v546_v53  ;;  %v609_v12 = vstv %s1181_s27  ;;  %v1255_v13 = vmax.f32 %v239_v59, 0.0  ;;  %s1275_s21 = sld [smem:[#allocation2 + $0x39]]  ;;  %s1282_s22 = sld [smem:[#allocation2 + $0x3a]] }
  0x38   :  { %v1257_v14 = vmax.f32 %v263_v60, 0.0  ;;  %v423_v15 = vadd.f32 %v422_v9, %v421_v48  ;;  %v580_v16 = vmul.f32 %v579_v58, %v1142_v2  ;;  %v1262_v17 = vmax.f32 %v295_v63, 0.0  ;;  %s1288_s23 = sld [smem:[#allocation2 + $0x40]]  ;;  %s1290_s24 = sld [smem:[#allocation2 + $0x41]] }
  0x39   :  { %v1264_v18 = vmax.f32 %v327_v1, 0.0  ;;  %v1266_v19 = vmax.f32 %v359_v5, 0.0  ;;  %v611_v20 = vstv %s1213_s7  ;;  %v1271_v21 = vmax.f32 %v391_v6, 0.0  ;;  %s1294_s25 = sld [smem:[#allocation2 + $0x42]]  ;;  %s1296_s26 = sld [smem:[#allocation2 + $0x43]] }
  0x3a   :  { %v455_v22 = vadd.f32 %v454_v10, %v453_v49  ;;  %v486_v23 = vstv %s1216_s8  ;;  %v518_v24 = vstv %s1218_s9  ;;  %v241_v25 = vstv %s1233_s11  ;;  %s1301_s27 = sld [smem:[#allocation2 + $0x44]]  ;;  %s1303_s28 = sld [smem:[#allocation2 + $0x45]] }
  0x3b   :  { %v265_v26 = vstv %s1235_s12  ;;  %v1279_v27 = vmax.f32 %v423_v15, 0.0  ;;  %v550_v28 = vstv %s1223_s10  ;;  %v242_v29 = vmul.f32 %v241_v25, %v1255_v13  ;;  %s1308_s0 = sld [smem:[#allocation2 + $0x3b]]  ;;  %s1313_s29 = sld [smem:[#allocation2 + $0x46]] }
  0x3c   :  { %v266_v30 = vmul.f32 %v265_v26, %v1257_v14  ;;  %v297_v31 = vstv %s1239_s13  ;;  %v329_v32 = vstv %s1241_s14  ;;  %v487_v35 = vadd.f32 %v486_v23, %v485_v51  ;;  %s1319_s30 = sld [smem:[#allocation2 + $0x47]]  ;;  %s1321_s3 = sld [smem:[#allocation2 + $0x48]] }
  0x3d   :  { %v298_v33 = vmul.f32 %v297_v31, %v1262_v17  ;;  %v330_v34 = vmul.f32 %v329_v32, %v1264_v18  ;;  %v519_v36 = vadd.f32 %v518_v24, %v517_v7  ;;  %v361_v38 = vstv %s1244_s15  ;;  %s1328_s4 = sld [smem:[#allocation2 + $0x49]]  ;;  %s1330_s5 = sld [smem:[#allocation2 + $0x4a]] }
  0x3e   :  { %v267_v37 = vadd.f32 %v266_v30, %v242_v29  ;;  %v393_v39 = vstv %s1246_s16  ;;  %v425_v40 = vstv %s1253_s18  ;;  %v551_v41 = vadd.f32 %v550_v28, %v549_v11  ;;  %s1337_s6 = sld [smem:[#allocation2 + $0x4b]]  ;;  %s1343_s7 = sld [smem:[#allocation2 + $0x50]] }
  0x3f   :  { %v610_v42 = vmul.f32 %v609_v12, %v1132_v0  ;;  %v612_v43 = vmul.f32 %v611_v20, %v1142_v2  ;;  %v641_v44 = vstv %s1229_s1  ;;  %v1310_v46 = vmax.f32 %v455_v22, 0.0  ;;  %s1345_s8 = sld [smem:[#allocation2 + $0x51]]  ;;  %s1349_s9 = sld [smem:[#allocation2 + $0x52]] }
  0x40   :  { %v299_v45 = vadd.f32 %v298_v33, %v267_v37  ;;  %v581_v47 = vadd.f32 %v580_v16, %v578_v8  ;;  %v582_v48 = vstv %s1251_s17  ;;  %v362_v49 = vmul.f32 %v361_v38, %v1266_v19  ;;  %s1351_s10 = sld [smem:[#allocation2 + $0x53]]  ;;  %s1356_s11 = sld [smem:[#allocation2 + $0x54]] }
  0x41   :  { %v394_v0 = vmul.f32 %v393_v39, %v1271_v21  ;;  %v426_v2 = vmul.f32 %v425_v40, %v1279_v27  ;;  %v457_v50 = vstv %s1260_s19  ;;  %v1323_v52 = vmax.f32 %v487_v35, 0.0  ;;  %s1358_s12 = sld [smem:[#allocation2 + $0x55]]  ;;  %s1365_s13 = sld [smem:[#allocation2 + $0x56]] }
  0x42   :  { %v331_v51 = vadd.f32 %v330_v34, %v299_v45  ;;  %v489_v53 = vstv %s1269_s20  ;;  %v1326_v54 = vmax.f32 %v519_v36, 0.0  ;;  %v243_v55 = vstv %s1288_s23  ;;  %s1377_s14 = sld [smem:[#allocation2 + $0x57]]  ;;  %s1382_s15 = sld [smem:[#allocation2 + $0x58]] }
  0x43   :  { %v268_v56 = vstv %s1290_s24  ;;  %v521_v57 = vstv %s1275_s21  ;;  %v1335_v58 = vmax.f32 %v551_v41, 0.0  ;;  %v244_v59 = vmul.f32 %v243_v55, %v1255_v13  ;;  %s1388_s16 = sld [smem:[#allocation2 + $0x59]]  ;;  %s1390_s17 = sld [smem:[#allocation2 + $0x5a]] }
  0x44   :  { %v269_v60 = vmul.f32 %v268_v56, %v1257_v14  ;;  %v300_v61 = vstv %s1294_s25  ;;  %v332_v62 = vstv %s1296_s26  ;;  %v363_v1 = vadd.f32 %v362_v49, %v331_v51  ;;  %s1396_s18 = sld [smem:[#allocation2 + $0x60]]  ;;  %s1398_s19 = sld [smem:[#allocation2 + $0x61]] }
  0x45   :  { %v301_v63 = vmul.f32 %v300_v61, %v1262_v17  ;;  %v553_v3 = vstv %s1282_s22  ;;  %v583_v4 = vadd.f32 %v582_v48, %v581_v47  ;;  %v333_v6 = vmul.f32 %v332_v62, %v1264_v18  ;;  %s1402_s20 = sld [smem:[#allocation2 + $0x62]]  ;;  %s1404_s21 = sld [smem:[#allocation2 + $0x63]] }
  0x46   :  { %v270_v5 = vadd.f32 %v269_v60, %v244_v59  ;;  %v364_v7 = vstv %s1301_s27  ;;  %v458_v8 = vmul.f32 %v457_v50, %v1310_v46  ;;  %v395_v9 = vadd.f32 %v394_v0, %v363_v1  ;;  %s1409_s22 = sld [smem:[#allocation2 + $0x64]]  ;;  %s1411_s23 = sld [smem:[#allocation2 + $0x65]] }
  0x47   :  { %v396_v10 = vstv %s1303_s28  ;;  %v490_v11 = vmul.f32 %v489_v53, %v1323_v52  ;;  %v1363_v12 = vmul.f32 %v521_v57, %v1326_v54  ;;  %v1368_v16 = vmul.f32 %v553_v3, %v1335_v58  ;;  %s1416_s24 = sld [smem:[#allocation2 + $0x66]]  ;;  %s1425_s25 = sld [smem:[#allocation2 + $0x5b]] }
  0x48   :  { %v302_v15 = vadd.f32 %v301_v63, %v270_v5  ;;  %v585_v20 = vstv %s1308_s0  ;;  %v1371_v22 = vadd.f32 %v612_v43, %v610_v42  ;;  %v365_v23 = vmul.f32 %v364_v7, %v1266_v19  ;;  %s1435_s26 = sld [smem:[#allocation2 + $0x67]]  ;;  %s1439_s27 = sld [smem:[#allocation2 + $0x68]] }
  0x49   :  { %v427_v24 = vadd.f32 %v426_v2, %v395_v9  ;;  %v428_v25 = vstv %s1313_s29  ;;  %v1375_v26 = vmax.f32 %v583_v4, 0.0  ;;  %v397_v29 = vmul.f32 %v396_v10, %v1271_v21  ;;  %s1444_s28 = sld [smem:[#allocation2 + $0x69]]  ;;  %s1446_s0 = sld [smem:[#allocation2 + $0x6a]] }
  0x4a   :  { %v334_v28 = vadd.f32 %v333_v6, %v302_v15  ;;  %v460_v30 = vstv %s1319_s30  ;;  %v492_v31 = vstv %s1321_s3  ;;  %v245_v32 = vstv %s1343_s7  ;;  %s1452_s29 = sld [smem:[#allocation2 + $0x70]]  ;;  %s1454_s30 = sld [smem:[#allocation2 + $0x71]] }
  0x4b   :  { %v271_v33 = vstv %s1345_s8  ;;  %v524_v34 = vstv %s1328_s4  ;;  %v556_v35 = vstv %s1330_s5  ;;  %v246_v36 = vmul.f32 %v245_v32, %v1255_v13  ;;  %s1459_s3 = sld [smem:[#allocation2 + $0x72]]  ;;  %s1461_s4 = sld [smem:[#allocation2 + $0x73]] }
  0x4c   :  { %v272_v37 = vmul.f32 %v271_v33, %v1257_v14  ;;  %v303_v38 = vstv %s1349_s9  ;;  %v335_v39 = vstv %s1351_s10  ;;  %v366_v41 = vadd.f32 %v365_v23, %v334_v28  ;;  %s1466_s5 = sld [smem:[#allocation2 + $0x74]]  ;;  %s1472_s7 = sld [smem:[#allocation2 + $0x76]] }
  0x4d   :  { %v304_v40 = vmul.f32 %v303_v38, %v1262_v17  ;;  %v459_v42 = vadd.f32 %v458_v8, %v427_v24  ;;  %v588_v43 = vstv %s1337_s6  ;;  %v336_v47 = vmul.f32 %v335_v39, %v1264_v18  ;;  %s1468_s6 = sld [smem:[#allocation2 + $0x75]]  ;;  %s1474_s8 = sld [smem:[#allocation2 + $0x77]] }
  0x4e   :  { %v273_v45 = vadd.f32 %v272_v37, %v246_v36  ;;  %v367_v48 = vstv %s1356_s11  ;;  %v399_v49 = vstv %s1358_s12  ;;  %v398_v0 = vadd.f32 %v397_v29, %v366_v41  ;;  %s1489_s9 = sld [smem:[#allocation2 + $0x78]]  ;;  %s1494_s10 = sld [smem:[#allocation2 + $0x79]] }
  0x4f   :  { %v429_v2 = vmul.f32 %v428_v25, %v1279_v27  ;;  %v431_v50 = vstv %s1365_s13  ;;  %v461_v51 = vmul.f32 %v460_v30, %v1310_v46  ;;  %v493_v55 = vmul.f32 %v492_v31, %v1323_v52  ;;  %s1496_s11 = sld [smem:[#allocation2 + $0x7a]]  ;;  %s1502_s12 = sld [smem:[#allocation2 + $0x80]] }
  0x50   :  { %v305_v53 = vadd.f32 %v304_v40, %v273_v45  ;;  %v1420_v56 = vmul.f32 %v524_v34, %v1326_v54  ;;  %v1423_v57 = vmul.f32 %v556_v35, %v1335_v58  ;;  %v368_v59 = vmul.f32 %v367_v48, %v1266_v19  ;;  %s1504_s13 = sld [smem:[#allocation2 + $0x81]]  ;;  %s1797_s1 = sld [smem:[#allocation2 + $0x1f]] }
  0x51   :  { %v400_v60 = vmul.f32 %v399_v49, %v1271_v21  ;;  %v1430_v61 = vmul.f32 %v585_v20, %v1375_v26  ;;  %v1433_v62 = vmul.f32 %v588_v43, %v1375_v26  ;;  %v432_v1 = vmul.f32 %v431_v50, %v1279_v27 }
  0x52   :  { %v337_v63 = vadd.f32 %v336_v47, %v305_v53  ;;  %v463_v3 = vstv %s1377_s14  ;;  %v491_v4 = vadd.f32 %v490_v11, %v459_v42  ;;  %v247_v5 = vstv %s1396_s18  ;;  %s1509_s14 = sld [smem:[#allocation2 + $0x82]]  ;;  %s1522_s18 = sld [smem:[#allocation2 + $0x86]] }
  0x53   :  { %v274_v6 = vstv %s1398_s19  ;;  %v430_v7 = vadd.f32 %v429_v2, %v398_v0  ;;  %v495_v8 = vstv %s1382_s15  ;;  %v248_v9 = vmul.f32 %v247_v5, %v1255_v13  ;;  %s1511_s15 = sld [smem:[#allocation2 + $0x83]]  ;;  %s1524_s19 = sld [smem:[#allocation2 + $0x87]] }
  0x54   :  { %v275_v10 = vmul.f32 %v274_v6, %v1257_v14  ;;  %v306_v15 = vstv %s1402_s20  ;;  %v338_v11 = vstv %s1404_s21  ;;  %v369_v23 = vadd.f32 %v368_v59, %v337_v63  ;;  %s1544_s20 = sld [smem:[#allocation2 + $0x88]]  ;;  %s1548_s21 = sld [smem:[#allocation2 + $0x89]] }
  0x55   :  { %v307_v20 = vmul.f32 %v306_v15, %v1262_v17  ;;  %v527_v24 = vstv %s1388_s16  ;;  %v559_v25 = vstv %s1390_s17  ;;  %v339_v29 = vmul.f32 %v338_v11, %v1264_v18  ;;  %s1515_s16 = sld [smem:[#allocation2 + $0x84]]  ;;  %s1517_s17 = sld [smem:[#allocation2 + $0x85]] }
  0x56   :  { %v276_v28 = vadd.f32 %v275_v10, %v248_v9  ;;  %v370_v30 = vstv %s1409_s22  ;;  %v402_v31 = vstv %s1411_s23  ;;  %v401_v32 = vadd.f32 %v400_v60, %v369_v23  ;;  %s1550_s22 = sld [smem:[#allocation2 + $0x8a]]  ;;  %s1556_s23 = sld [smem:[#allocation2 + $0x90]] }
  0x57   :  { %v434_v33 = vstv %s1416_s24  ;;  %v462_v34 = vadd.f32 %v461_v51, %v430_v7  ;;  %v464_v35 = vmul.f32 %v463_v3, %v1310_v46  ;;  %v496_v37 = vmul.f32 %v495_v8, %v1323_v52  ;;  %s1558_s24 = sld [smem:[#allocation2 + $0x91]] }
  0x58   :  { %v308_v36 = vadd.f32 %v307_v20, %v276_v28  ;;  %v523_v38 = vadd.f32 %v1363_v12, %v491_v4  ;;  %v1479_v39 = vmul.f32 %v527_v24, %v1326_v54  ;;  %v371_v40 = vmul.f32 %v370_v30, %v1266_v19 }
  0x59   :  { %v403_v41 = vmul.f32 %v402_v31, %v1271_v21  ;;  %v1484_v42 = vmul.f32 %v559_v25, %v1335_v58  ;;  %v591_v43 = vstv %s1425_s25  ;;  %v433_v47 = vadd.f32 %v432_v1, %v401_v32  ;;  %s1732_s25 = sld [smem:[#allocation2 + $0xac]] }
  0x5a   :  { %v340_v45 = vadd.f32 %v339_v29, %v308_v36  ;;  %v435_v48 = vmul.f32 %v434_v33, %v1279_v27  ;;  %v466_v49 = vstv %s1435_s26  ;;  %v249_v12 = vstv %s1452_s29  ;;  %s1563_s26 = sld [smem:[#allocation2 + $0x92]]  ;;  %s1577_s29 = sld [smem:[#allocation2 + $0x96]] }
  0x5b   :  { %v277_v0 = vstv %s1454_s30  ;;  %v494_v2 = vadd.f32 %v493_v55, %v462_v34  ;;  %v498_v50 = vstv %s1439_s27  ;;  %v250_v51 = vmul.f32 %v249_v12, %v1255_v13  ;;  %s1565_s27 = sld [smem:[#allocation2 + $0x93]]  ;;  %s1593_s30 = sld [smem:[#allocation2 + $0x97]] }
  0x5c   :  { %v278_v53 = vmul.f32 %v277_v0, %v1257_v14  ;;  %v309_v59 = vstv %s1459_s3  ;;  %v341_v60 = vstv %s1461_s4  ;;  %v372_v63 = vadd.f32 %v371_v40, %v340_v45  ;;  %s1598_s3 = sld [smem:[#allocation2 + $0x98]]  ;;  %s1603_s4 = sld [smem:[#allocation2 + $0x99]] }
  0x5d   :  { %v310_v55 = vmul.f32 %v309_v59, %v1262_v17  ;;  %v530_v1 = vstv %s1444_s28  ;;  %v562_v3 = vstv %s1446_s0  ;;  %v342_v5 = vmul.f32 %v341_v60, %v1264_v18  ;;  %s1570_s28 = sld [smem:[#allocation2 + $0x94]]  ;;  %s1572_s0 = sld [smem:[#allocation2 + $0x95]] }
  0x5e   :  { %v279_v4 = vadd.f32 %v278_v53, %v250_v51  ;;  %v373_v6 = vstv %s1466_s5  ;;  %v465_v7 = vadd.f32 %v464_v35, %v433_v47  ;;  %v404_v8 = vadd.f32 %v403_v41, %v372_v63  ;;  %s1605_s5 = sld [smem:[#allocation2 + $0x9a]] }
  0x5f   :  { %v405_v9 = vstv %s1468_s6  ;;  %v437_v10 = vstv %s1472_s7  ;;  %v469_v15 = vstv %s1474_s8  ;;  %v467_v20 = vmul.f32 %v466_v49, %v1310_v46  ;;  %s1611_s6 = sld [smem:[#allocation2 + $0xa0]]  ;;  %s1613_s7 = sld [smem:[#allocation2 + $0xa1]] }
  0x60   :  { %v311_v11 = vadd.f32 %v310_v55, %v279_v4  ;;  %v499_v23 = vmul.f32 %v498_v50, %v1323_v52  ;;  %v1529_v24 = vadd.f32 %v1368_v16, %v523_v38  ;;  %v374_v25 = vmul.f32 %v373_v6, %v1266_v19  ;;  %s1617_s8 = sld [smem:[#allocation2 + $0xa2]] }
  0x61   :  { %v526_v28 = vadd.f32 %v1420_v56, %v494_v2  ;;  %v1534_v29 = vmul.f32 %v530_v1, %v1326_v54  ;;  %v1537_v30 = vmul.f32 %v562_v3, %v1335_v58  ;;  %v406_v32 = vmul.f32 %v405_v9, %v1271_v21 }
  0x62   :  { %v343_v31 = vadd.f32 %v342_v5, %v311_v11  ;;  %v438_v33 = vmul.f32 %v437_v10, %v1279_v27  ;;  %v1542_v16 = vmul.f32 %v469_v15, %v1310_v46  ;;  %v251_v56 = vstv %s1502_s12  ;;  %s1631_s12 = sld [smem:[#allocation2 + $0xa6]] }
  0x63   :  { %v280_v34 = vstv %s1504_s13  ;;  %v436_v35 = vadd.f32 %v435_v48, %v404_v8  ;;  %v497_v36 = vadd.f32 %v496_v37, %v465_v7  ;;  %v252_v38 = vmul.f32 %v251_v56, %v1255_v13  ;;  %s1643_s13 = sld [smem:[#allocation2 + $0xa7]] }
  0x64   :  { %v281_v40 = vmul.f32 %v280_v34, %v1257_v14  ;;  %v312_v41 = vstv %s1509_s14  ;;  %v344_v45 = vstv %s1511_s15  ;;  %v375_v47 = vadd.f32 %v374_v25, %v343_v31  ;;  %s1648_s14 = sld [smem:[#allocation2 + $0xa8]]  ;;  %s1650_s15 = sld [smem:[#allocation2 + $0xa9]] }
  0x65   :  { %v313_v37 = vmul.f32 %v312_v41, %v1262_v17  ;;  %v501_v48 = vstv %s1489_s9  ;;  %v533_v49 = vstv %s1494_s10  ;;  %v345_v0 = vmul.f32 %v344_v45, %v1264_v18  ;;  %s1619_s9 = sld [smem:[#allocation2 + $0xa3]]  ;;  %s1624_s10 = sld [smem:[#allocation2 + $0xa4]] }
  0x66   :  { %v282_v12 = vadd.f32 %v281_v40, %v252_v38  ;;  %v376_v2 = vstv %s1515_s16  ;;  %v565_v50 = vstv %s1496_s11  ;;  %v408_v51 = vstv %s1517_s17  ;;  %s1626_s11 = sld [smem:[#allocation2 + $0xa5]]  ;;  %s1655_s16 = sld [smem:[#allocation2 + $0x6b]] }
  0x67   :  { %v440_v53 = vstv %s1522_s18  ;;  %v468_v59 = vadd.f32 %v467_v20, %v436_v35  ;;  %v472_v60 = vstv %s1524_s19  ;;  %v1580_v63 = vmul.f32 %v501_v48, %v1323_v52  ;;  %s1657_s17 = sld [smem:[#allocation2 + $0xaa]]  ;;  %s1663_s18 = sld [smem:[#allocation2 + $0x7b]] }
  0x68   :  { %v314_v55 = vadd.f32 %v313_v37, %v282_v12  ;;  %v529_v1 = vadd.f32 %v1479_v39, %v497_v36  ;;  %v1584_v3 = vadd.f32 %v1423_v57, %v526_v28  ;;  %v377_v4 = vmul.f32 %v376_v2, %v1266_v19  ;;  %s1668_s19 = sld [smem:[#allocation2 + $0x8b]] }
  0x69   :  { %v407_v5 = vadd.f32 %v406_v32, %v375_v47  ;;  %v1588_v6 = vmul.f32 %v533_v49, %v1326_v54  ;;  %v1591_v7 = vmul.f32 %v565_v50, %v1335_v58  ;;  %v409_v9 = vmul.f32 %v408_v51, %v1271_v21 }
  0x6a   :  { %v346_v8 = vadd.f32 %v345_v0, %v314_v55  ;;  %v441_v39 = vmul.f32 %v440_v53, %v1279_v27  ;;  %v473_v57 = vmul.f32 %v472_v60, %v1310_v46  ;;  %v253_v10 = vstv %s1556_s23  ;;  %s1690_s23 = sld [smem:[#allocation2 + $0x4c]] }
  0x6b   :  { %v283_v15 = vstv %s1558_s24  ;;  %v500_v11 = vadd.f32 %v499_v23, %v468_v59  ;;  %v504_v20 = vstv %s1544_s20  ;;  %v254_v25 = vmul.f32 %v253_v10, %v1255_v13  ;;  %s1678_s20 = sld [smem:[#allocation2 + $0x2c]]  ;;  %s1692_s24 = sld [smem:[#allocation2 + $0xab]] }
  0x6c   :  { %v284_v28 = vmul.f32 %v283_v15, %v1257_v14  ;;  %v315_v31 = vstv %s1563_s26  ;;  %v347_v32 = vstv %s1565_s27  ;;  %v378_v56 = vadd.f32 %v377_v4, %v346_v8  ;;  %s1697_s26 = sld [smem:[#allocation2 + $0x5c]] }
  0x6d   :  { %v316_v23 = vmul.f32 %v315_v31, %v1262_v17  ;;  %v439_v34 = vadd.f32 %v438_v33, %v407_v5  ;;  %v536_v35 = vstv %s1548_s21  ;;  %v348_v38 = vmul.f32 %v347_v32, %v1264_v18  ;;  %s1683_s21 = sld [smem:[#allocation2 + $0x3c]] }
  0x6e   :  { %v285_v36 = vadd.f32 %v284_v28, %v254_v25  ;;  %v379_v40 = vstv %s1570_s28  ;;  %v568_v41 = vstv %s1550_s22  ;;  %v410_v45 = vadd.f32 %v409_v9, %v378_v56  ;;  %s1685_s22 = sld [smem:[#allocation2 + $0x9b]]  ;;  %s1699_s27 = sld [smem:[#allocation2 + $0x6c]] }
  0x6f   :  { %v411_v37 = vstv %s1572_s0  ;;  %v443_v47 = vstv %s1577_s29  ;;  %v505_v33 = vmul.f32 %v504_v20, %v1323_v52  ;;  %v532_v49 = vadd.f32 %v1534_v29, %v500_v11  ;;  %s1703_s28 = sld [smem:[#allocation2 + $0x1b]]  ;;  %s1705_s0 = sld [smem:[#allocation2 + $0x7c]] }
  0x70   :  { %v317_v48 = vadd.f32 %v316_v23, %v285_v36  ;;  %v537_v12 = vmul.f32 %v536_v35, %v1326_v54  ;;  %v1636_v0 = vadd.f32 %v1484_v42, %v529_v1  ;;  %v380_v2 = vmul.f32 %v379_v40, %v1266_v19  ;;  %s1712_s29 = sld [smem:[#allocation2 + $0x8c]] }
  0x71   :  { %v442_v50 = vadd.f32 %v441_v39, %v410_v45  ;;  %v471_v51 = vadd.f32 %v1542_v16, %v439_v34  ;;  %v1641_v53 = vmul.f32 %v568_v41, %v1335_v58  ;;  %v412_v29 = vmul.f32 %v411_v37, %v1271_v21 }
  0x72   :  { %v349_v59 = vadd.f32 %v348_v38, %v317_v48  ;;  %v444_v60 = vmul.f32 %v443_v47, %v1279_v27  ;;  %v475_v55 = vstv %s1593_s30  ;;  %v255_v42 = vstv %s1611_s6  ;;  %s1714_s30 = sld [smem:[#allocation2 + $0x9c]]  ;;  %s1745_s6 = sld [smem:[#allocation2 + $0x1d]] }
  0x73   :  { %v286_v16 = vstv %s1613_s7  ;;  %v474_v1 = vadd.f32 %v473_v57, %v442_v50  ;;  %v507_v4 = vstv %s1598_s3  ;;  %v256_v5 = vmul.f32 %v255_v42, %v1255_v13  ;;  %s1737_s3 = sld [smem:[#allocation2 + $0x2d]]  ;;  %s1750_s7 = sld [smem:[#allocation2 + $0x1e]] }
  0x74   :  { %v287_v8 = vmul.f32 %v286_v16, %v1257_v14  ;;  %v318_v9 = vstv %s1617_s8  ;;  %v350_v39 = vstv %s1619_s9  ;;  %v381_v57 = vadd.f32 %v380_v2, %v349_v59  ;;  %s1752_s8 = sld [smem:[#allocation2 + $0x2e]] }
  0x75   :  { %v319_v10 = vmul.f32 %v318_v9, %v1262_v17  ;;  %v382_v15 = vstv %s1624_s10  ;;  %v503_v11 = vadd.f32 %v1580_v63, %v471_v51  ;;  %v351_v25 = vmul.f32 %v350_v39, %v1264_v18  ;;  %s1756_s9 = sld [smem:[#allocation2 + $0x3e]]  ;;  %s1758_s10 = sld [smem:[#allocation2 + $0x4d]] }
  0x76   :  { %v288_v20 = vadd.f32 %v287_v8, %v256_v5  ;;  %v476_v13 = vmul.f32 %v475_v55, %v1310_v46  ;;  %v539_v14 = vstv %s1603_s4  ;;  %v413_v28 = vadd.f32 %v412_v29, %v381_v57  ;;  %s1739_s4 = sld [smem:[#allocation2 + $0x3d]] }
  0x77   :  { %v414_v31 = vstv %s1626_s11  ;;  %v508_v32 = vmul.f32 %v507_v4, %v1323_v52  ;;  %v571_v23 = vstv %s1605_s5  ;;  %v383_v17 = vmul.f32 %v382_v15, %v1266_v19  ;;  %s1743_s5 = sld [smem:[#allocation2 + $0x1c]]  ;;  %s1762_s11 = sld [smem:[#allocation2 + $0x5d]] }
  0x78   :  { %v320_v56 = vadd.f32 %v319_v10, %v288_v20  ;;  %v446_v34 = vstv %s1631_s12  ;;  %v506_v35 = vadd.f32 %v505_v33, %v474_v1  ;;  %v445_v63 = vadd.f32 %v444_v60, %v413_v28  ;;  %s1764_s12 = sld [smem:[#allocation2 + $0x6d]] }
  0x79   :  { %v535_v18 = vadd.f32 %v1588_v6, %v503_v11  ;;  %v540_v36 = vmul.f32 %v539_v14, %v1326_v54  ;;  %v564_v38 = vadd.f32 %v1537_v30, %v532_v49  ;;  %v415_v40 = vmul.f32 %v414_v31, %v1271_v21 }
  0x7a   :  { %v352_v19 = vadd.f32 %v351_v25, %v320_v56  ;;  %v478_v41 = vstv %s1643_s13  ;;  %v572_v45 = vmul.f32 %v571_v23, %v1335_v58  ;;  %v447_v30 = vmul.f32 %v446_v34, %v1279_v27  ;;  %s1769_s13 = sld [smem:[#allocation2 + $0x7d]] }
  0x7b   :  { %v477_v6 = vadd.f32 %v476_v13, %v445_v63  ;;  %v510_v37 = vstv %s1648_s14  ;;  %v542_v47 = vstv %s1650_s15  ;;  %v538_v33 = vadd.f32 %v537_v12, %v506_v35  ;;  %s1771_s14 = sld [smem:[#allocation2 + $0x8d]] }
  0x7c   :  { %v384_v21 = vadd.f32 %v383_v17, %v352_v19  ;;  %v574_v48 = vstv %s1657_s17  ;;  %v594_v49 = vstv %s1655_s16  ;;  %v479_v2 = vmul.f32 %v478_v41, %v1310_v46  ;;  %s1773_s15 = sld [smem:[#allocation2 + $0x9d]]  ;;  %s1783_s17 = sld [smem:[#allocation2 + $0x4e]] }
  0x7d   :  { %v509_v50 = vadd.f32 %v508_v32, %v477_v6  ;;  %v592_v27 = vmul.f32 %v591_v43, %v1375_v26  ;;  %v597_v51 = vstv %s1663_s18  ;;  %v511_v12 = vmul.f32 %v510_v37, %v1323_v52  ;;  %s1775_s16 = sld [smem:[#allocation2 + $0xad]]  ;;  %s1785_s18 = sld [smem:[#allocation2 + $0x5e]] }
  0x7e   :  { %v416_v59 = vadd.f32 %v415_v40, %v384_v21  ;;  %v595_v29 = vmul.f32 %v594_v49, %v1375_v26  ;;  %v600_v60 = vstv %s1668_s19  ;;  %v543_v55 = vmul.f32 %v542_v47, %v1326_v54  ;;  %s1788_s19 = sld [smem:[#allocation2 + $0x6e]] }
  0x7f   :  { %v567_v46 = vadd.f32 %v1591_v7, %v535_v18  ;;  %v575_v42 = vmul.f32 %v574_v48, %v1335_v58  ;;  %v598_v43 = vmul.f32 %v597_v51, %v1375_v26  ;;  %v570_v1 = vadd.f32 %v1641_v53, %v538_v33  ;;  %v1778_v18 = vld [vmem:[#allocation6] sm:$0xff] }
  0x80   :  { %v448_v16 = vadd.f32 %v447_v30, %v416_v59  ;;  %v1726_v4 = vadd.f32 %v1430_v61, %v1529_v24  ;;  %v1730_v52 = vadd.f32 %v1433_v62, %v1584_v3  ;;  %v541_v54 = vadd.f32 %v540_v36, %v509_v50 }
  0x81   :  { %v593_v58 = vadd.f32 %v592_v27, %v1636_v0  ;;  %v601_v7 = vmul.f32 %v600_v60, %v1375_v26  ;;  %v614_v5 = vstv %s1678_s20  ;;  %v596_v24 = vadd.f32 %v595_v29, %v564_v38  ;;  %s1790_s20 = sld [smem:[#allocation2 + $0x7e]] }
  0x82   :  { %v480_v61 = vadd.f32 %v479_v2, %v448_v16  ;;  %v603_v62 = vstv %s1685_s22  ;;  %v615_v3 = vadd.f32 %v614_v5, %v1371_v22  ;;  %v599_v0 = vadd.f32 %v598_v43, %v567_v46  ;;  %s1813_s22 = sld [smem:[#allocation2 + $0x9e]] }
  0x83   :  { %v606_v53 = vstv %s1692_s24  ;;  %v617_v8 = vstv %s1683_s21  ;;  %v620_v9 = vstv %s1690_s23  ;;  %v623_v57 = vstv %s1697_s26  ;;  %s1809_s21 = sld [smem:[#allocation2 + $0x8e]]  ;;  %s1821_s24 = sld [smem:[#allocation2 + $0x2f]] }
  0x84   :  { %v512_v39 = vadd.f32 %v511_v12, %v480_v61  ;;  %v616_v10 = vmax.f32 %v615_v3, 0.0  ;;  %v626_v22 = vstv %s1699_s27  ;;  %v573_v15 = vadd.f32 %v572_v45, %v541_v54  ;;  %v1792_v45 = vld [vmem:[#allocation6 + $0x8] sm:$0xff]  ;;  %s1815_s23 = sld [smem:[#allocation2 + $0xae]]  ;;  %s1826_s26 = sld [smem:[#allocation2 + $0x3f]] }
  0x85   :  { %v602_v11 = vadd.f32 %v601_v7, %v570_v1  ;;  %v604_v20 = vmul.f32 %v603_v62, %v1375_v26  ;;  %v629_v25 = vstv %s1705_s0  ;;  %v632_v14 = vstv %s1712_s29  ;;  %s1834_s27 = sld [smem:[#allocation2 + $0x4f]] }
  0x86   :  { %v544_v13 = vadd.f32 %v543_v55, %v512_v39  ;;  %v635_v28 = vstv %s1714_s30  ;;  %v643_v31 = vstv %s1703_s28  ;;  %v618_v32 = vmul.f32 %v617_v8, %v616_v10  ;;  %s1836_s28 = sld [smem:[#allocation2 + $0x5f]] }
  0x87   :  { %v621_v23 = vmul.f32 %v620_v9, %v616_v10  ;;  %v624_v56 = vmul.f32 %v623_v57, %v616_v10  ;;  %v627_v17 = vmul.f32 %v626_v22, %v616_v10  ;;  %v607_v35 = vmul.f32 %v606_v53, %v1375_v26  ;;  %s1842_s0 = sld [smem:[#allocation2 + $0x6f]] }
  0x88   :  { %v576_v34 = vadd.f32 %v575_v42, %v544_v13  ;;  %v630_v63 = vmul.f32 %v629_v25, %v616_v10  ;;  %v642_v36 = vmul.f32 %v1778_v18, %v641_v44  ;;  %v605_v38 = vadd.f32 %v604_v20, %v573_v15  ;;  %s1844_s29 = sld [smem:[#allocation2 + $0x7f]] }
  0x89   :  { %v633_v19 = vmul.f32 %v632_v14, %v616_v10  ;;  %v636_v40 = vmul.f32 %v635_v28, %v616_v10  ;;  %v638_v41 = vstv %s1732_s25  ;;  %v644_v26 = vmul.f32 %v1792_v45, %v643_v31  ;;  %s1849_s30 = sld [smem:[#allocation2 + $0x8f]] }
  0x8a   :  { %v646_v30 = vstv %s1737_s3  ;;  %v649_v6 = vstv %s1739_s4  ;;  %v1800_v44 = vadd.f32 %v618_v32, %v1726_v4  ;;  %v1803_v37 = vadd.f32 %v621_v23, %v1730_v52  ;;  %s1852_s25 = sld [smem:[#allocation2 + $0x9f]]  ;;  %s1857_s4 = sld [smem:[#allocation2 + $0xb0]] }
  0x8b   :  { %v1805_v47 = vadd.f32 %v624_v56, %v593_v58  ;;  %v1807_v21 = vadd.f32 %v627_v17, %v596_v24  ;;  %v608_v33 = vadd.f32 %v607_v35, %v576_v34  ;;  %v1811_v48 = vadd.f32 %v630_v63, %v599_v0  ;;  %s1854_s3 = sld [smem:[#allocation2 + $0xaf]] }
  0x8c   :  { %v639_v49 = vmul.f32 %v638_v41, %v616_v10  ;;  %v645_v2 = vadd.f32 %v644_v26, %v642_v36  ;;  %v634_v50 = vadd.f32 %v633_v19, %v602_v11  ;;  %v1817_v27 = vadd.f32 %v636_v40, %v605_v38 }
  0x8d   :  { %v673_v51 = vstv %s1743_s5  ;;  %v675_v59 = vstv %s1745_s6  ;;  %v652_v29 = vstv %s1758_s10  ;;  %v655_v46 = vstv %s1762_s11  ;;  %s1859_s5 = sld [smem:[#allocation2 + $0xb8]]  ;;  %s1863_s6 = sld [smem:[#allocation2 + $0xb1]] }
  0x8e   :  { %v647_v12 = vadd.f32 %v646_v30, %v645_v2  ;;  %v674_v60 = vmul.f32 %v1778_v18, %v673_v51  ;;  %v676_v55 = vmul.f32 %v1792_v45, %v675_v59  ;;  %v658_v42 = vstv %s1764_s12  ;;  %s1880_s10 = sld [smem:[#allocation2 + $0xb4]]  ;;  %s1882_s11 = sld [smem:[#allocation2 + $0xb5]] }
  0x8f   :  { %v661_v43 = vstv %s1769_s13  ;;  %v664_v16 = vstv %s1771_s14  ;;  %v640_v1 = vadd.f32 %v639_v49, %v608_v33  ;;  %v667_v52 = vstv %s1773_s15  ;;  %s1890_s12 = sld [smem:[#allocation2 + $0xb6]]  ;;  %s1898_s13 = sld [smem:[#allocation2 + $0xba]] }
  0x90   :  { %v648_v4 = vmax.f32 %v647_v12, 0.0  ;;  %v670_v54 = vstv %s1775_s16  ;;  %v678_v58 = vstv %s1752_s8  ;;  %v681_v7 = vstv %s1756_s9  ;;  %s1874_s8 = sld [smem:[#allocation2 + $0xb2]]  ;;  %s1876_s9 = sld [smem:[#allocation2 + $0xb3]] }
  0x91   :  { %v684_v5 = vstv %s1783_s17  ;;  %v687_v61 = vstv %s1785_s18  ;;  %v677_v24 = vadd.f32 %v676_v55, %v674_v60  ;;  %v690_v62 = vstv %s1788_s19  ;;  %s1900_s14 = sld [smem:[#allocation2 + $0xb7]]  ;;  %s1902_s15 = sld [smem:[#allocation2 + $0xbb]] }
  0x92   :  { %v693_v3 = vstv %s1790_s20  ;;  %v705_v0 = vstv %s1750_s7  ;;  %v650_v53 = vmul.f32 %v649_v6, %v648_v4  ;;  %v653_v8 = vmul.f32 %v652_v29, %v648_v4  ;;  %s1865_s7 = sld [smem:[#allocation2 + $0xb9]]  ;;  %s1908_s16 = sld [smem:[#allocation2 + $0xbc]] }
  0x93   :  { %v656_v9 = vmul.f32 %v655_v46, %v648_v4  ;;  %v707_v39 = vstv %s1797_s1  ;;  %v659_v10 = vmul.f32 %v658_v42, %v648_v4  ;;  %v662_v57 = vmul.f32 %v661_v43, %v648_v4  ;;  %s1910_s17 = sld [smem:[#allocation2 + $0xbd]]  ;;  %s1913_s18 = sld [smem:[#allocation2 + $0xbe]] }
  0x94   :  { %v665_v22 = vmul.f32 %v664_v16, %v648_v4  ;;  %v696_v15 = vstv %s1809_s21  ;;  %v668_v11 = vmul.f32 %v667_v52, %v648_v4  ;;  %v671_v20 = vmul.f32 %v670_v54, %v648_v4  ;;  %s993_s19 = sld [smem:[#allocation2 + $0xbf]]  ;;  %s994_s20 = sld [smem:[#allocation2 + $0xc0]] }
  0x95   :  { %v699_v25 = vstv %s1813_s22  ;;  %v702_v13 = vstv %s1815_s23  ;;  %v679_v14 = vadd.f32 %v678_v58, %v677_v24  ;;  %v706_v28 = vmul.f32 %v1778_v18, %v705_v0  ;;  %s1066_s1 = smov [#allocation7]  }
  0x96   :  { %v708_v31 = vmul.f32 %v1792_v45, %v707_v39  ;;  %v710_v32 = vstv %s1821_s24  ;;  %v651_v23 = vadd.f32 %v650_v53, %v1800_v44  ;;  %v654_v56 = vadd.f32 %v653_v8, %v1803_v37  ;;  %s793_s21 = sshll.u32 %s1066_s1, 4  ;;  %s794_s21 = int_to_ptr.vmem [resolvable:$true] %s793_s21 }
  0x97   :  { %v657_v17 = vadd.f32 %v656_v9, %v1805_v47  ;;  %v713_v34 = vstv %s1826_s26  ;;  %v660_v35 = vadd.f32 %v659_v10, %v1807_v21  ;;  %v663_v63 = vadd.f32 %v662_v57, %v1811_v48  ;;  %s1034_s22 = scalar_lea.vmem %s794_s21, 128  ;;  %p1039_p12 = scmp.lt.s32.totalorder %s794_s21, %s794_s21 }
  0x98   :  { %v666_v18 = vadd.f32 %v665_v22, %v634_v50  ;;  %v680_v36 = vmax.f32 %v679_v14, 0.0  ;;  %v669_v38 = vadd.f32 %v668_v11, %v1817_v27  ;;  %v672_v19 = vadd.f32 %v671_v20, %v640_v1  ;;  %p1035_p11 = scmp.ne.s32.totalorder %s794_s21, %s1034_s22  ;;  %p1040_p13 = scmp.lt.s32.totalorder %s1034_s22, %s1034_s22 }
  0x99   :  { %v716_v40 = vstv %s1834_s27  ;;  %v719_v41 = vstv %s1836_s28  ;;  %v709_v26 = vadd.f32 %v708_v31, %v706_v28  ;;  %v722_v30 = vstv %s1842_s0 }
  0x9a   :  { %v682_v45 = vmul.f32 %v681_v7, %v680_v36  ;;  %v725_v6 = vstv %s1844_s29  ;;  %v685_v44 = vmul.f32 %v684_v5, %v680_v36  ;;  %v688_v37 = vmul.f32 %v687_v61, %v680_v36  ;;  %p1041_p0 = por %p1040_p13, %p1039_p12 }
  0x9b   :  { %v691_v47 = vmul.f32 %v690_v62, %v680_v36  ;;  %v694_v21 = vmul.f32 %v693_v3, %v680_v36  ;;  %v697_v33 = vmul.f32 %v696_v15, %v680_v36  ;;  %v700_v48 = vmul.f32 %v699_v25, %v680_v36 }
  0x9c   :  { %v703_v49 = vmul.f32 %v702_v13, %v680_v36  ;;  %v728_v2 = vstv %s1849_s30  ;;  %v731_v50 = vstv %s1852_s25  ;;  %v734_v27 = vstv %s1854_s3  ;;  %p1042_p1 = pnand %p1041_p0, %p1035_p11 }
  0x9d   :  { %v737_v51 = vstv %s1857_s4  ;;  %v740_v59 = vstv %s1859_s5  ;;  %v683_v12 = vadd.f32 %v682_v45, %v651_v23  ;;  %v711_v29 = vadd.f32 %v710_v32, %v709_v26 }
  0x9e   :  { %v742_v60 = vstv %s1863_s6  ;;  %v745_v55 = vstv %s1865_s7  ;;  %v686_v46 = vadd.f32 %v685_v44, %v654_v56  ;;  %v689_v42 = vadd.f32 %v688_v37, %v657_v17 }
  0x9f   :  { %v692_v43 = vadd.f32 %v691_v47, %v660_v35  ;;  %v695_v16 = vadd.f32 %v694_v21, %v663_v63  ;;  %v698_v1 = vadd.f32 %v697_v33, %v666_v18  ;;  %v701_v4 = vadd.f32 %v700_v48, %v669_v38 }
  0xa0   :  { %v704_v52 = vadd.f32 %v703_v49, %v672_v19  ;;  %v712_v54 = vmax.f32 %v711_v29, 0.0  ;;  %v748_v58 = vstv %s1874_s8  ;;  %v754_v7 = vstv %s1876_s9 }
  0xa1   :  { %v760_v5 = vstv %s1880_s10  ;;  %v766_v61 = vstv %s1882_s11  ;;  %v772_v13 = vstv %s1890_s12  ;;  %v751_v56 = vstv %s1898_s13 }
  0xa2   :  { %v714_v24 = vmul.f32 %v713_v34, %v712_v54  ;;  %v717_v62 = vmul.f32 %v716_v40, %v712_v54  ;;  %v720_v3 = vmul.f32 %v719_v41, %v712_v54  ;;  %v723_v0 = vmul.f32 %v722_v30, %v712_v54 }
  0xa3   :  { %v726_v53 = vmul.f32 %v725_v6, %v712_v54  ;;  %v729_v8 = vmul.f32 %v728_v2, %v712_v54  ;;  %v732_v9 = vmul.f32 %v731_v50, %v712_v54  ;;  %v735_v39 = vmul.f32 %v734_v27, %v712_v54 }
  0xa4   :  { %v715_v10 = vadd.f32 %v714_v24, %v683_v12  ;;  %v718_v57 = vadd.f32 %v717_v62, %v686_v46  ;;  %v721_v22 = vadd.f32 %v720_v3, %v689_v42  ;;  %v724_v15 = vadd.f32 %v723_v0, %v692_v43 }
  0xa5   :  { %v727_v11 = vadd.f32 %v726_v53, %v695_v16  ;;  %v730_v20 = vadd.f32 %v729_v8, %v698_v1  ;;  %v733_v25 = vadd.f32 %v732_v9, %v701_v4  ;;  %v736_v23 = vadd.f32 %v735_v39, %v704_v52 }
  0xa6   :  { %v738_v14 = vadd.f32 %v737_v51, %v715_v10  ;;  %v743_v28 = vadd.f32 %v742_v60, %v718_v57  ;;  %v749_v31 = vadd.f32 %v748_v58, %v721_v22  ;;  %v755_v32 = vadd.f32 %v754_v7, %v724_v15 }
  0xa7   :  { %v761_v17 = vadd.f32 %v760_v5, %v727_v11  ;;  %v767_v34 = vadd.f32 %v766_v61, %v730_v20  ;;  %v757_v38 = vstv %s1902_s15  ;;  %v773_v19 = vadd.f32 %v772_v13, %v733_v25 }
  0xa8   :  { %v739_v35 = vmax.f32 %v738_v14, 0.0  ;;  %v744_v63 = vmax.f32 %v743_v28, 0.0  ;;  %v750_v18 = vmax.f32 %v749_v31, 0.0  ;;  %v756_v36 = vmax.f32 %v755_v32, 0.0 }
  0xa9   :  { %v778_v40 = vstv %s1900_s14  ;;  %v762_v30 = vmax.f32 %v761_v17, 0.0  ;;  %v763_v6 = vstv %s1908_s16  ;;  %v768_v47 = vmax.f32 %v767_v34, 0.0 }
  0xaa   :  { %v741_v41 = vmul.f32 %v740_v59, %v739_v35  ;;  %v746_v45 = vmul.f32 %v745_v55, %v744_v63  ;;  %v752_v26 = vmul.f32 %v751_v56, %v750_v18  ;;  %v758_v37 = vmul.f32 %v757_v38, %v756_v36 }
  0xab   :  { %v779_v21 = vadd.f32 %v778_v40, %v736_v23  ;;  %v769_v33 = vstv %s1910_s17  ;;  %v764_v49 = vmul.f32 %v763_v6, %v762_v30  ;;  %v774_v2 = vmax.f32 %v773_v19, 0.0 }
  0xac   :  { %v747_v44 = vadd.f32 %v746_v45, %v741_v41  ;;  %v775_v50 = vstv %s1913_s18  ;;  %v770_v51 = vmul.f32 %v769_v33, %v768_v47  ;;  %v781_v29 = vstv %s993_s19 }
  0xad   :  { %v780_v12 = vmax.f32 %v779_v21, 0.0  ;;  %v776_v59 = vmul.f32 %v775_v50, %v774_v2  ;;  %v784_v43 = vstv %s994_s20 }
  0xae   :  { %v753_v48 = vadd.f32 %v752_v26, %v747_v44 }
  0xaf   :  { %v782_v46 = vmul.f32 %v781_v29, %v780_v12 }
  0xb0   :  { %v759_v27 = vadd.f32 %v758_v37, %v753_v48 }
  0xb2   :  { %v765_v60 = vadd.f32 %v764_v49, %v759_v27 }
  0xb4   :  { %v771_v55 = vadd.f32 %v770_v51, %v765_v60 }
  0xb6   :  { %v777_v42 = vadd.f32 %v776_v59, %v771_v55 }
  0xb8   :  { %v783_v16 = vadd.f32 %v782_v46, %v777_v42 }
  0xba   :  { %v785_v1 = vadd.f32 %v784_v43, %v783_v16 }
  0xbc   :  { %786 = vst [vmem:[#allocation7] sm:$0xff] %v785_v1 }
  0xbd   :  { %1045 = shalt.err (!%p1042_p1)
}
  0xbe   :  { %s1046_s26 = scalar_lea.hbm %s1935_s2, 128 }
  0xbf   :  { %p1047_p2 = scmp.ne.s32.totalorder %s1935_s2, %s1046_s26  ;;  %p1050_p3 = scmp.lt.u32.totalorder %s1046_s26, %s1935_s2 }
  0xc1   :  { %p1052_p4 = pnand %p1050_p3, %p1047_p2 }
  0xc3   :  { %1055 = shalt.err (!%p1052_p4)
}
  0xc4   :  { %796 = dma.vmem_to_hbm [thread:$0]  %s794_s21, 128, %s1935_s2, [#allocation4]  }
  0xc5   :  { %1060 = dma.done.wait [#allocation4], 128  }
  0xc6   :  { %1061 = vsyncadd [#allocation4], 4294967168 }
  0xc7   :  { %800 = vsyncpa [#allocation3], 1 }
  0xc8   :  { %801 = vsyncpa [#allocation4], 1 }
  0xc9   :  { %802 = vsyncpa [#allocation5], 1 }

</bundles_post_ra>
